<compile_context>
chip_gen: v7x
topology: tpu7x:2x2x1
jax: 0.10.0
libtpu: 0.0.40
codegen_flags: <defaults>
</compile_context>

<pallas_src>
import functools
import numpy as np
import jax
import jax.numpy as jnp
from jax.experimental import pallas as pl
from jax.experimental.pallas import tpu as pltpu


def _gated_conv_kernel(up_ref, left_ref, wv_ref, bv_ref, wh_ref, bh_ref,
                       w2_ref, b2_ref, out_ref, *, n_filters, kernel_size, dilation):
    C = n_filters
    K = kernel_size
    d = dilation
    rf = d * (K - 1)
    tm, W, _ = out_ref.shape          # row-tile height, image width, 2C

    # ---- vertical ("up") causal conv: one deep-contraction GEMM ----
    up_blk = up_ref[...]              # (tm + rf, W + rf, C) bf16 (includes halo rows)
    taps_v = jnp.concatenate(
        [up_blk[kh * d:kh * d + tm, kw * d:kw * d + W, :]
         for kh in range(K) for kw in range(K)],
        axis=-1).reshape(tm * W, K * K * C)                       # (tm*W, K*K*C)
    # wv_ref already has up_conv_1x1 folded in -> 4C output columns.
    up_big = jnp.dot(taps_v, wv_ref[...],
                     preferred_element_type=jnp.float32) + bv_ref[...]   # f32 (tm*W, 4C)
    up_feat = up_big[:, :2 * C]       # vertical conv features (pre-gating)
    up_proj = up_big[:, 2 * C:]       # up_conv_1x1(up_feat), already biased

    # gated activation in f32 (VPU/EUP)
    up_out = jnp.tanh(up_feat[:, :C]) * jax.nn.sigmoid(up_feat[:, C:])

    # ---- horizontal ("left") causal conv: one deep-contraction GEMM ----
    left_blk = left_ref[...]          # (tm, W + rf, C) bf16
    taps_h = jnp.concatenate(
        [left_blk[:, kw * d:kw * d + W, :] for kw in range(K)],
        axis=-1).reshape(tm * W, K * C)                           # (tm*W, K*C)
    left_feat = (jnp.dot(taps_h, wh_ref[...], preferred_element_type=jnp.float32)
                 + bh_ref[...] + up_proj)

    gated = jnp.tanh(left_feat[:, :C]) * jax.nn.sigmoid(left_feat[:, C:])
    left_out = jnp.dot(gated.astype(w2_ref.dtype), w2_ref[...],
                       preferred_element_type=jnp.float32) + b2_ref[...]

    # residual: the unpadded left input is the right rf:-slice of the padded block
    residual = left_blk[:, rf:, :].reshape(tm * W, C).astype(jnp.float32)
    left_out = left_out + residual

    # single lane-denser (2C-wide) output slab: [up_out || left_out]
    out = jnp.concatenate([up_out, left_out], axis=-1)            # (tm*W, 2C)
    out_ref[...] = out.reshape(tm, W, 2 * C).astype(out_ref.dtype)


def _pick_row_tile(H, target):
    tm = max(1, min(int(target), H))
    while H % tm != 0:
        tm -= 1
    return tm


def gated_conv_forward(up_nchw, left_nchw, params, *, kernel_size=3, dilation=1,
                       row_tile=256):
    B, C, H, W = up_nchw.shape
    K, d = kernel_size, dilation
    rf = d * (K - 1)
    C2 = 2 * C

    tm = _pick_row_tile(H, row_tile)
    n_tiles = H // tm

    # NHWC; bf16 for the HBM-dominant activation tensors (f32 accumulation in-kernel).
    up = jnp.transpose(up_nchw, (0, 2, 3, 1)).astype(jnp.bfloat16)
    left = jnp.transpose(left_nchw, (0, 2, 3, 1)).astype(jnp.bfloat16)

    # Causal padding, same as the torch ConstantPad2d calls.
    up_p = jnp.pad(up, ((0, 0), (rf, 0), (rf // 2, rf // 2), (0, 0)))   # (B, H+rf, W+rf, C)
    left_p = jnp.pad(left, ((0, 0), (0, 0), (rf, 0), (0, 0)))           # (B, H,    W+rf, C)
    Wp = up_p.shape[2]
    Wrf = left_p.shape[2]

    # Row tiles with the rf halo rows the vertical conv needs from above.
    # TODO(synk): express the halo directly via pl.Element / manual DMA to avoid this
    # cheap (~(1 + rf/tm)x) wrapper-side window materialization.
    up_win = jnp.stack([up_p[:, i * tm:i * tm + tm + rf] for i in range(n_tiles)],
                       axis=1)                                          # (B, T, tm+rf, Wp, C)
    left_win = left_p.reshape(B, n_tiles, tm, Wrf, C)                   # no halo needed

    # --- weight re-layout: torch OIHW -> flattened (contraction, out) matrices ---
    # kernel_mask is all-ones for the default mask_center=False, so no masking here.
    # TODO(synk): for mask_center=True, zero the masked taps of wv/wh before flattening.
    wv_flat = jnp.transpose(params['wv'], (2, 3, 1, 0)).reshape(K * K * C, C2)   # (K*K*C, 2C)
    wh_flat = jnp.transpose(params['wh'][:, :, 0, :], (2, 1, 0)).reshape(K * C, C2)
    w1_mat = jnp.transpose(params['w1'][:, :, 0, 0])                    # (2C, 2C)  (in, out)
    w2_mat = jnp.transpose(params['w2'][:, :, 0, 0])                    # (C, C)

    # Fold up_conv_1x1 into the vertical weights: cols 2C: give up_feat @ w1 + b1.
    wv_aug = jnp.concatenate([wv_flat, wv_flat @ w1_mat], axis=1)       # (K*K*C, 4C)
    bv_aug = jnp.concatenate(
        [params['bv'], params['bv'] @ w1_mat + params['b1']]).reshape(1, 4 * C)

    wv_aug_b = wv_aug.astype(jnp.bfloat16)
    wh_b = wh_flat.astype(jnp.bfloat16)
    w2_b = w2_mat.astype(jnp.bfloat16)
    bv_aug = bv_aug.astype(jnp.float32)
    bh = params['bh'].reshape(1, C2).astype(jnp.float32)
    b2 = params['b2'].reshape(1, C).astype(jnp.float32)

    kern = functools.partial(_gated_conv_kernel, n_filters=C,
                             kernel_size=K, dilation=d)

    out = pl.pallas_call(
        kern,
        out_shape=jax.ShapeDtypeStruct((B, H, W, 2 * C), jnp.float32),
        grid=(B, n_tiles),
        in_specs=[
            pl.BlockSpec((None, None, tm + rf, Wp, C), lambda b, m: (b, m, 0, 0, 0)),  # up tile
            pl.BlockSpec((None, None, tm, Wrf, C), lambda b, m: (b, m, 0, 0, 0)),      # left tile
            pl.BlockSpec((K * K * C, 4 * C), lambda b, m: (0, 0)),                     # wv_aug
            pl.BlockSpec((1, 4 * C), lambda b, m: (0, 0)),                             # bv_aug
            pl.BlockSpec((K * C, C2), lambda b, m: (0, 0)),                            # wh
            pl.BlockSpec((1, C2), lambda b, m: (0, 0)),                                # bh
            pl.BlockSpec((C, C), lambda b, m: (0, 0)),                                 # w2
            pl.BlockSpec((1, C), lambda b, m: (0, 0)),                                 # b2
        ],
        out_specs=pl.BlockSpec((None, tm, W, 2 * C), lambda b, m: (b, m, 0, 0)),
        compiler_params=pltpu.CompilerParams(
            dimension_semantics=("parallel", "parallel")),
    )(up_win, left_win, wv_aug_b, bv_aug, wh_b, bh, w2_b, b2)

    up_out = jnp.transpose(out[..., :C], (0, 3, 1, 2))     # back to NCHW
    left_out = jnp.transpose(out[..., C:], (0, 3, 1, 2))
    return up_out, left_out


# ----------------- deterministic parameter init (module __init__ shapes) -----------------
def init_params(key, n_filters, kernel_size=3):
    C, C2, K = n_filters, 2 * n_filters, kernel_size
    ks = jax.random.split(key, 8)
    s = 0.1
    return dict(
        wv=s * jax.random.normal(ks[0], (C2, C, K, K), jnp.float32),   # VerticalConvolution.conv
        bv=s * jax.random.normal(ks[1], (C2,), jnp.float32),
        wh=s * jax.random.normal(ks[2], (C2, C, 1, K), jnp.float32),   # HorizontalConvolution.conv
        bh=s * jax.random.normal(ks[3], (C2,), jnp.float32),
        w1=s * jax.random.normal(ks[4], (C2, C2, 1, 1), jnp.float32),  # up_conv_1x1
        b1=s * jax.random.normal(ks[5], (C2,), jnp.float32),
        w2=s * jax.random.normal(ks[6], (C, C, 1, 1), jnp.float32),    # left_conv_1x1
        b2=s * jax.random.normal(ks[7], (C,), jnp.float32),
    )


# ----------------- pure-JAX reference (mirrors the PyTorch forward, f32) -----------------
def _conv_ref(x, w, b, pad_lrtb, dilation=1):
    l, r, t, btm = pad_lrtb
    xp = jnp.pad(x, ((0, 0), (0, 0), (t, btm), (l, r)))
    y = jax.lax.conv_general_dilated(
        xp, w, window_strides=(1, 1), padding='VALID',
        rhs_dilation=(dilation, dilation),
        dimension_numbers=('NCHW', 'OIHW', 'NCHW'),
        precision=jax.lax.Precision.HIGHEST)
    return y + b[None, :, None, None]


def ref_forward(up, left, p, kernel_size=3, dilation=1):
    C = up.shape[1]
    rf = dilation * (kernel_size - 1)
    up_feat = _conv_ref(up, p['wv'], p['bv'], (rf // 2, rf // 2, rf, 0), dilation)
    up_out = jnp.tanh(up_feat[:, :C]) * jax.nn.sigmoid(up_feat[:, C:])
    left_feat = _conv_ref(left, p['wh'], p['bh'], (rf, 0, 0, 0), dilation)
    left_feat = left_feat + _conv_ref(up_feat, p['w1'], p['b1'], (0, 0, 0, 0))
    gated = jnp.tanh(left_feat[:, :C]) * jax.nn.sigmoid(left_feat[:, C:])
    left_out = _conv_ref(gated, p['w2'], p['b2'], (0, 0, 0, 0))
    return up_out, left_out + left


if __name__ == "__main__":
    key = jax.random.PRNGKey(0)
    k1, k2, k3 = jax.random.split(key, 3)
    B, C, H, W = 2, 4, 16, 16          # batch, n_filters, spatial
    up = jax.random.normal(k1, (B, C, H, W), jnp.float32)
    left = jax.random.normal(k2, (B, C, H, W), jnp.float32)
    params = init_params(k3, C)

    # row_tile=8 -> 2 row tiles per image, exercising the halo path.
    up_o, left_o = jax.block_until_ready(
        gated_conv_forward(up, left, params, row_tile=8))

    up_r, left_r = ref_forward(up, left, params)
    # bf16 MXU inputs (f32 accumulation) -> looser tolerance than the f32 reference.
    np.testing.assert_allclose(np.asarray(up_o), np.asarray(up_r), atol=3e-2, rtol=3e-2)
    np.testing.assert_allclose(np.asarray(left_o), np.asarray(left_r), atol=3e-2, rtol=3e-2)
    print("KERNEL_OK")
</pallas_src>

<mosaic_0001>
module attributes {stable_mosaic.version = 11 : i64} {
  func.func @_gated_conv_kernel(%arg0: i32, %arg1: i32, %arg2: memref<1x1x10x18x4xbf16, #tpu.memory_space<vmem>>, %arg3: memref<1x1x8x18x4xbf16, #tpu.memory_space<vmem>>, %arg4: memref<36x16xbf16, #tpu.memory_space<vmem>>, %arg5: memref<1x16xf32, #tpu.memory_space<vmem>>, %arg6: memref<12x8xbf16, #tpu.memory_space<vmem>>, %arg7: memref<1x8xf32, #tpu.memory_space<vmem>>, %arg8: memref<4x4xbf16, #tpu.memory_space<vmem>>, %arg9: memref<1x4xf32, #tpu.memory_space<vmem>>, %arg10: memref<1x8x16x8xf32, #tpu.memory_space<vmem>>) attributes {dimension_semantics = [#tpu.dimension_semantics<parallel>, #tpu.dimension_semantics<parallel>], iteration_bounds = array<i64: 2, 2>, scalar_prefetch = 0 : i64, scratch_operands = 0 : i64, tpu.core_type = #tpu.core_type<tc>, window_params = [{transform_indices = @transform_0, window_bounds = array<i64: 1, 1, 10, 18, 4>}, {transform_indices = @transform_1, window_bounds = array<i64: 1, 1, 8, 18, 4>}, {pipeline_mode = #tpu.pipeline_mode<synchronous>, transform_indices = @transform_2, window_bounds = array<i64: 36, 16>}, {pipeline_mode = #tpu.pipeline_mode<synchronous>, transform_indices = @transform_3, window_bounds = array<i64: 1, 16>}, {pipeline_mode = #tpu.pipeline_mode<synchronous>, transform_indices = @transform_4, window_bounds = array<i64: 12, 8>}, {pipeline_mode = #tpu.pipeline_mode<synchronous>, transform_indices = @transform_5, window_bounds = array<i64: 1, 8>}, {pipeline_mode = #tpu.pipeline_mode<synchronous>, transform_indices = @transform_6, window_bounds = array<i64: 4, 4>}, {pipeline_mode = #tpu.pipeline_mode<synchronous>, transform_indices = @transform_7, window_bounds = array<i64: 1, 4>}, {transform_indices = @transform_8, window_bounds = array<i64: 1, 8, 16, 8>}]} {
    %c0 = arith.constant 0 : index
    %c0_0 = arith.constant 0 : index
    %c0_1 = arith.constant 0 : index
    %c0_2 = arith.constant 0 : index
    %c0_3 = arith.constant 0 : index
    %0 = vector.load %arg2[%c0, %c0_0, %c0_1, %c0_2, %c0_3] : memref<1x1x10x18x4xbf16, #tpu.memory_space<vmem>>, vector<1x1x10x18x4xbf16>
    %1 = vector.shape_cast %0 : vector<1x1x10x18x4xbf16> to vector<10x18x4xbf16>
    %2 = vector.extract_strided_slice %1 {offsets = [0, 0, 0], sizes = [8, 16, 4], strides = [1, 1, 1]} : vector<10x18x4xbf16> to vector<8x16x4xbf16>
    %3 = vector.extract_strided_slice %1 {offsets = [0, 1, 0], sizes = [8, 16, 4], strides = [1, 1, 1]} : vector<10x18x4xbf16> to vector<8x16x4xbf16>
    %4 = vector.extract_strided_slice %1 {offsets = [0, 2, 0], sizes = [8, 16, 4], strides = [1, 1, 1]} : vector<10x18x4xbf16> to vector<8x16x4xbf16>
    %5 = vector.extract_strided_slice %1 {offsets = [1, 0, 0], sizes = [8, 16, 4], strides = [1, 1, 1]} : vector<10x18x4xbf16> to vector<8x16x4xbf16>
    %6 = vector.extract_strided_slice %1 {offsets = [1, 1, 0], sizes = [8, 16, 4], strides = [1, 1, 1]} : vector<10x18x4xbf16> to vector<8x16x4xbf16>
    %7 = vector.extract_strided_slice %1 {offsets = [1, 2, 0], sizes = [8, 16, 4], strides = [1, 1, 1]} : vector<10x18x4xbf16> to vector<8x16x4xbf16>
    %8 = vector.extract_strided_slice %1 {offsets = [2, 0, 0], sizes = [8, 16, 4], strides = [1, 1, 1]} : vector<10x18x4xbf16> to vector<8x16x4xbf16>
    %9 = vector.extract_strided_slice %1 {offsets = [2, 1, 0], sizes = [8, 16, 4], strides = [1, 1, 1]} : vector<10x18x4xbf16> to vector<8x16x4xbf16>
    %10 = vector.extract_strided_slice %1 {offsets = [2, 2, 0], sizes = [8, 16, 4], strides = [1, 1, 1]} : vector<10x18x4xbf16> to vector<8x16x4xbf16>
    %11 = tpu.concatenate %2, %3, %4, %5, %6, %7, %8, %9, %10 in 2 : vector<8x16x4xbf16>, vector<8x16x4xbf16>, vector<8x16x4xbf16>, vector<8x16x4xbf16>, vector<8x16x4xbf16>, vector<8x16x4xbf16>, vector<8x16x4xbf16>, vector<8x16x4xbf16>, vector<8x16x4xbf16> -> vector<8x16x36xbf16>
    %12 = vector.shape_cast %11 : vector<8x16x36xbf16> to vector<128x36xbf16>
    %c0_4 = arith.constant 0 : index
    %c0_5 = arith.constant 0 : index
    %13 = vector.load %arg4[%c0_4, %c0_5] : memref<36x16xbf16, #tpu.memory_space<vmem>>, vector<36x16xbf16>
    %cst = arith.constant dense<0.000000e+00> : vector<128x16xf32>
    %14 = tpu.matmul %12, %13, %cst {dimension_numbers = #tpu.dot_dimension_numbers<[1], [0], [0], [1], [0, 0, 1, 1], [], []>} : vector<128x36xbf16>, vector<36x16xbf16>, vector<128x16xf32> -> vector<128x16xf32>
    %c0_6 = arith.constant 0 : index
    %c0_7 = arith.constant 0 : index
    %15 = vector.load %arg5[%c0_6, %c0_7] : memref<1x16xf32, #tpu.memory_space<vmem>>, vector<1x16xf32>
    %16 = vector.broadcast %15 : vector<1x16xf32> to vector<128x16xf32>
    %17 = arith.addf %14, %16 : vector<128x16xf32>
    %18 = vector.extract_strided_slice %17 {offsets = [0, 0], sizes = [128, 8], strides = [1, 1]} : vector<128x16xf32> to vector<128x8xf32>
    %19 = vector.extract_strided_slice %17 {offsets = [0, 8], sizes = [128, 8], strides = [1, 1]} : vector<128x16xf32> to vector<128x8xf32>
    %20 = vector.extract_strided_slice %18 {offsets = [0, 0], sizes = [128, 4], strides = [1, 1]} : vector<128x8xf32> to vector<128x4xf32>
    %21 = math.tanh %20 : vector<128x4xf32>
    %22 = vector.extract_strided_slice %18 {offsets = [0, 4], sizes = [128, 4], strides = [1, 1]} : vector<128x8xf32> to vector<128x4xf32>
    %23 = arith.negf %22 : vector<128x4xf32>
    %24 = math.exp %23 : vector<128x4xf32>
    %cst_8 = arith.constant 1.000000e+00 : f32
    %25 = vector.broadcast %cst_8 : f32 to vector<128x4xf32>
    %26 = arith.addf %25, %24 : vector<128x4xf32>
    %27 = arith.divf %25, %26 : vector<128x4xf32>
    %28 = arith.mulf %21, %27 : vector<128x4xf32>
    %c0_9 = arith.constant 0 : index
    %c0_10 = arith.constant 0 : index
    %c0_11 = arith.constant 0 : index
    %c0_12 = arith.constant 0 : index
    %c0_13 = arith.constant 0 : index
    %29 = vector.load %arg3[%c0_9, %c0_10, %c0_11, %c0_12, %c0_13] : memref<1x1x8x18x4xbf16, #tpu.memory_space<vmem>>, vector<1x1x8x18x4xbf16>
    %30 = vector.shape_cast %29 : vector<1x1x8x18x4xbf16> to vector<8x18x4xbf16>
    %31 = vector.extract_strided_slice %30 {offsets = [0, 0, 0], sizes = [8, 16, 4], strides = [1, 1, 1]} : vector<8x18x4xbf16> to vector<8x16x4xbf16>
    %32 = vector.extract_strided_slice %30 {offsets = [0, 1, 0], sizes = [8, 16, 4], strides = [1, 1, 1]} : vector<8x18x4xbf16> to vector<8x16x4xbf16>
    %33 = vector.extract_strided_slice %30 {offsets = [0, 2, 0], sizes = [8, 16, 4], strides = [1, 1, 1]} : vector<8x18x4xbf16> to vector<8x16x4xbf16>
    %34 = tpu.concatenate %31, %32, %33 in 2 : vector<8x16x4xbf16>, vector<8x16x4xbf16>, vector<8x16x4xbf16> -> vector<8x16x12xbf16>
    %35 = vector.shape_cast %34 : vector<8x16x12xbf16> to vector<128x12xbf16>
    %c0_14 = arith.constant 0 : index
    %c0_15 = arith.constant 0 : index
    %36 = vector.load %arg6[%c0_14, %c0_15] : memref<12x8xbf16, #tpu.memory_space<vmem>>, vector<12x8xbf16>
    %cst_16 = arith.constant dense<0.000000e+00> : vector<128x8xf32>
    %37 = tpu.matmul %35, %36, %cst_16 {dimension_numbers = #tpu.dot_dimension_numbers<[1], [0], [0], [1], [0, 0, 1, 1], [], []>} : vector<128x12xbf16>, vector<12x8xbf16>, vector<128x8xf32> -> vector<128x8xf32>
    %c0_17 = arith.constant 0 : index
    %c0_18 = arith.constant 0 : index
    %38 = vector.load %arg7[%c0_17, %c0_18] : memref<1x8xf32, #tpu.memory_space<vmem>>, vector<1x8xf32>
    %39 = vector.broadcast %38 : vector<1x8xf32> to vector<128x8xf32>
    %40 = arith.addf %37, %39 : vector<128x8xf32>
    %41 = arith.addf %40, %19 : vector<128x8xf32>
    %42 = vector.extract_strided_slice %41 {offsets = [0, 0], sizes = [128, 4], strides = [1, 1]} : vector<128x8xf32> to vector<128x4xf32>
    %43 = math.tanh %42 : vector<128x4xf32>
    %44 = vector.extract_strided_slice %41 {offsets = [0, 4], sizes = [128, 4], strides = [1, 1]} : vector<128x8xf32> to vector<128x4xf32>
    %45 = arith.negf %44 : vector<128x4xf32>
    %46 = math.exp %45 : vector<128x4xf32>
    %cst_19 = arith.constant 1.000000e+00 : f32
    %47 = vector.broadcast %cst_19 : f32 to vector<128x4xf32>
    %48 = arith.addf %47, %46 : vector<128x4xf32>
    %49 = arith.divf %47, %48 : vector<128x4xf32>
    %50 = arith.mulf %43, %49 : vector<128x4xf32>
    %51 = arith.truncf %50 : vector<128x4xf32> to vector<128x4xbf16>
    %c0_20 = arith.constant 0 : index
    %c0_21 = arith.constant 0 : index
    %52 = vector.load %arg8[%c0_20, %c0_21] : memref<4x4xbf16, #tpu.memory_space<vmem>>, vector<4x4xbf16>
    %cst_22 = arith.constant dense<0.000000e+00> : vector<128x4xf32>
    %53 = tpu.matmul %51, %52, %cst_22 {dimension_numbers = #tpu.dot_dimension_numbers<[1], [0], [0], [1], [0, 0, 1, 1], [], []>} : vector<128x4xbf16>, vector<4x4xbf16>, vector<128x4xf32> -> vector<128x4xf32>
    %c0_23 = arith.constant 0 : index
    %c0_24 = arith.constant 0 : index
    %54 = vector.load %arg9[%c0_23, %c0_24] : memref<1x4xf32, #tpu.memory_space<vmem>>, vector<1x4xf32>
    %55 = vector.broadcast %54 : vector<1x4xf32> to vector<128x4xf32>
    %56 = arith.addf %53, %55 : vector<128x4xf32>
    %57 = vector.extract_strided_slice %30 {offsets = [0, 2, 0], sizes = [8, 16, 4], strides = [1, 1, 1]} : vector<8x18x4xbf16> to vector<8x16x4xbf16>
    %58 = vector.shape_cast %57 : vector<8x16x4xbf16> to vector<128x4xbf16>
    %59 = arith.extf %58 : vector<128x4xbf16> to vector<128x4xf32>
    %60 = arith.addf %56, %59 : vector<128x4xf32>
    %61 = tpu.concatenate %28, %60 in 1 : vector<128x4xf32>, vector<128x4xf32> -> vector<128x8xf32>
    %62 = vector.shape_cast %61 : vector<128x8xf32> to vector<8x16x8xf32>
    %c0_25 = arith.constant 0 : index
    %c0_26 = arith.constant 0 : index
    %c0_27 = arith.constant 0 : index
    %c0_28 = arith.constant 0 : index
    %63 = vector.load %arg10[%c0_25, %c0_26, %c0_27, %c0_28] : memref<1x8x16x8xf32, #tpu.memory_space<vmem>>, vector<1x8x16x8xf32>
    %64 = vector.shape_cast %63 : vector<1x8x16x8xf32> to vector<8x16x8xf32>
    %65 = vector.shape_cast %62 : vector<8x16x8xf32> to vector<1x8x16x8xf32>
    tpu.vector_store %arg10[%c0_25, %c0_26, %c0_27, %c0_28], %65 {strides = array<i32>} : memref<1x8x16x8xf32, #tpu.memory_space<vmem>>, vector<1x8x16x8xf32>,
    return
  }
  func.func @transform_0(%arg0: i32, %arg1: i32) -> (i32, i32, i32, i32, i32) {
    %c0_i32 = arith.constant 0 : i32
    %c0_i32_0 = arith.constant 0 : i32
    %c0_i32_1 = arith.constant 0 : i32
    %c0_i32_2 = arith.constant 0 : i32
    return %arg0, %arg1, %c0_i32, %c0_i32_0, %c0_i32_1 : i32, i32, i32, i32, i32
  }
  func.func @transform_1(%arg0: i32, %arg1: i32) -> (i32, i32, i32, i32, i32) {
    %c0_i32 = arith.constant 0 : i32
    %c0_i32_0 = arith.constant 0 : i32
    %c0_i32_1 = arith.constant 0 : i32
    %c0_i32_2 = arith.constant 0 : i32
    return %arg0, %arg1, %c0_i32, %c0_i32_0, %c0_i32_1 : i32, i32, i32, i32, i32
  }
  func.func @transform_2(%arg0: i32, %arg1: i32) -> (i32, i32) {
    %c0_i32 = arith.constant 0 : i32
    %c0_i32_0 = arith.constant 0 : i32
    %c0_i32_1 = arith.constant 0 : i32
    return %c0_i32, %c0_i32_0 : i32, i32
  }
  func.func @transform_3(%arg0: i32, %arg1: i32) -> (i32, i32) {
    %c0_i32 = arith.constant 0 : i32
    %c0_i32_0 = arith.constant 0 : i32
    %c0_i32_1 = arith.constant 0 : i32
    return %c0_i32, %c0_i32_0 : i32, i32
  }
  func.func @transform_4(%arg0: i32, %arg1: i32) -> (i32, i32) {
    %c0_i32 = arith.constant 0 : i32
    %c0_i32_0 = arith.constant 0 : i32
    %c0_i32_1 = arith.constant 0 : i32
    return %c0_i32, %c0_i32_0 : i32, i32
  }
  func.func @transform_5(%arg0: i32, %arg1: i32) -> (i32, i32) {
    %c0_i32 = arith.constant 0 : i32
    %c0_i32_0 = arith.constant 0 : i32
    %c0_i32_1 = arith.constant 0 : i32
    return %c0_i32, %c0_i32_0 : i32, i32
  }
  func.func @transform_6(%arg0: i32, %arg1: i32) -> (i32, i32) {
    %c0_i32 = arith.constant 0 : i32
    %c0_i32_0 = arith.constant 0 : i32
    %c0_i32_1 = arith.constant 0 : i32
    return %c0_i32, %c0_i32_0 : i32, i32
  }
  func.func @transform_7(%arg0: i32, %arg1: i32) -> (i32, i32) {
    %c0_i32 = arith.constant 0 : i32
    %c0_i32_0 = arith.constant 0 : i32
    %c0_i32_1 = arith.constant 0 : i32
    return %c0_i32, %c0_i32_0 : i32, i32
  }
  func.func @transform_8(%arg0: i32, %arg1: i32) -> (i32, i32, i32, i32) {
    %c0_i32 = arith.constant 0 : i32
    %c0_i32_0 = arith.constant 0 : i32
    %c0_i32_1 = arith.constant 0 : i32
    return %arg0, %arg1, %c0_i32, %c0_i32_0 : i32, i32, i32, i32
  }
}

</mosaic_0001>

<bundles_post_ra>
// kernel: tpu_custom_call.1
= control target key start
LH: loop header
LB: loop body
LE: loop exit
PB: predicated region body
PF: predicated region fallthrough
CT: control target
= control target key end

     0   :  { %s2999_s27 = smov 0   ;;  %s3001_s28 = smov 0   ;;  %s3964_s0 = inlined_call_operand.vmem [shape: bf16[2,2,10,18,4], index: 0, kind: input, shape index: {}]   ;;  %s3965_s1 = inlined_call_operand.vmem [shape: bf16[2,2,8,18,4], index: 1, kind: input, shape index: {}]   ;;  %s3966_s2 = inlined_call_operand.vmem [shape: bf16[36,16], index: 2, kind: input, shape index: {}]   ;;  %s3967_s3 = inlined_call_operand.vmem [shape: f32[1,16], index: 3, kind: input, shape index: {}]   ;;  %s3968_s4 = inlined_call_operand.vmem [shape: bf16[12,8], index: 4, kind: input, shape index: {}]   ;;  %s3969_s5 = inlined_call_operand.vmem [shape: f32[1,8], index: 5, kind: input, shape index: {}]   ;;  %s3970_s6 = inlined_call_operand.vmem [shape: bf16[4,4], index: 6, kind: input, shape index: {}]   ;;  %s3971_s7 = inlined_call_operand.vmem [shape: f32[1,4], index: 7, kind: input, shape index: {}]   ;;  %s3972_s8 = inlined_call_operand.vmem [shape: f32[2,16,16,8], index: 8, kind: output, shape index: {}]  }
   0x1   :  { %s3003_s29 = smov 0   ;;  %s3005_s30 = smov 0  }
   0x2   :  { %s3007_s9 = smov 0  }
   0x3 LB: > { %s27_s10 = sadd.s32 1, %s2934_s29  ;;  %s30_s11 = sadd.s32 1, %s2938_s30  ;;  %s2942_s9 = sphi %s3007_s9, %s18_s9   ;;  %s2938_s30 = sphi %s3005_s30, %s3981_s30   ;;  %s2934_s29 = sphi %s3003_s29, %s3980_s29   ;;  %s2930_s28 = sphi %s3001_s28, %s3979_s28   ;;  %s2926_s27 = sphi %s2999_s27, %s3978_s27  }
   0x4   : > { %p28_p0 = scmp.ge.s32.totalorder %s27_s10, 2  ;;  %p2385_p1 = scmp.ge.s32.totalorder %s2942_s9, 1 }
   0x5   : > { %p298_p2 = scmp.lt.s32.totalorder %s2942_s9, 5 }
   0x6   : > { %s3983_s10 = smov (%p28_p0, %s27_s10), 0  ;;  %s3985_s11 = smov (!%p28_p0, %s30_s11), %s2938_s30 }
   0x7   : > { %p299_p3 = pnand %p2385_p1, %p298_p2  ;;  %p32_p4 = scmp.ge.s32.totalorder %s3985_s11, 2 }
   0x8   : > { %p350_p5 = scmp.lt.s32.totalorder (!%p299_p3), %s2930_s28, 1  ;;  %p352_p6 = scmp.lt.s32.totalorder (!%p299_p3), %s2926_s27, 1  ;;  %vm587_vm0 = vcmask (!%p299_p3), 1046528   ;;  %vm474_vm1 = vsmask.f32 (!%p299_p3), 7424  ;;  %v2668_v44 = vld [vmem:[%s3966_s2] sm:$0xff] (!%p299_p3)  }
   0x9   : > { %s3987_s11 = smov (%p32_p4, %s3985_s11), 0  ;;  %302 = sbr.rel (%p299_p3) target bundleno = 1089 (0x441), region = 52 }
   0xa   : > { %s2944_s20 = smov (!%p299_p3), 12   ;;  %s2945_s21 = smov (!%p299_p3), 20   ;;  %2530 = vmatprep.subr.bf16.mxu0 (!%p299_p3), %v2668_v44  ;;  %v2669_v45 = vld [vmem:[%s3966_s2 + $0x8] sm:$0xff] (!%p299_p3)   ;;  %v2674_v49 = vld [vmem:[%s3966_s2 + $0x10] ss:$0 sps:$4 sm:$0x33] (!%p299_p3)  }
   0xb   : > { %s2946_s22 = smov (!%p299_p3), 8   ;;  %s2947_s23 = smov (!%p299_p3), 4   ;;  %2531 = vmatpush3.bf16.msra.mxu0 (!%p299_p3), %v2668_v44  ;;  %vm950_vm2 = vcmask (!%p299_p3), 1041408   ;;  %vm1545_vm3 = vcmask (!%p299_p3), 1045504   ;;  %vm770_vm4 = vcmask (!%p299_p3), 31744   ;;  %vm787_vm5 = vcmask (!%p299_p3), 64512  }
   0xc   : > { %s2948_s24 = smov (!%p299_p3), 16   ;;  %2532 = vmatprep.subr.bf16.mxu0 (!%p299_p3), %v2669_v45  ;;  %s3973_s25 = smov (!%p299_p3), 32   ;;  %v952_v54 = vsel (!%p299_p3), %vm950_vm2, %v2674_v49, 0  ;;  %vm804_vm6 = vcmask (!%p299_p3), 97280   ;;  %vm821_vm7 = vcmask (!%p299_p3), 130048   ;;  %vm838_vm8 = vcmask (!%p299_p3), 162816  }
   0xd   : > { %vm855_vm9 = vcmask (!%p299_p3), 195584   ;;  %vm872_vm10 = vcmask (!%p299_p3), 228352   ;;  %vm889_vm11 = vcmask (!%p299_p3), 261120   ;;  %vm933_vm12 = vcmask (!%p299_p3), 293888  }
   0xe   : > { %vm2058_vm13 = vcmask (!%p299_p3), 1042432   ;;  %vm2059_vm14 = vcmask (!%p299_p3), 1046532  }
   0xf   : > { %2533 = vmatpush3.bf16.msra.mxu0 (!%p299_p3), %v2669_v45  ;;  %vm3769_vm15 = vmor (!%p299_p3), %vm2058_vm13, %vm2059_vm14 }
  0x10   : > { %s3989_s28 = smov (!%p350_p5, %s2930_s28), 1  ;;  %2590 = vmatprep.subr.msk.bf16.mxu0 %vm950_vm2, %v2674_v49 }
  0x11   : > { %s3035_s12 = scalar_select %p352_p6, %s2926_s27, 1 }
  0x12   : > { %s2595_s13 = smul.u32 60, %s3989_s28 }
  0x13   : > { %s2594_s14 = smul.u32 30, %s3035_s12  ;;  %2535 = vmatpush3.bf16.msra.mxu0 %v952_v54 }
  0x14   : > { %s2596_s26 = smul.u32 24, %s3035_s12 }
  0x15   : > { %s356_s15 = sadd.s32 %s2595_s13, %s2594_s14  ;;  %s2949_s13 = smov 24  }
  0x16   : > { %s2386_s16 = sshll.u32 %s356_s15, 2  ;;  %s2597_s14 = smul.u32 48, %s3989_s28 }
  0x17   : > { %s3042_s19 = scalar_lea.vmem %s3964_s0, %s2386_s16  ;;  %s2950_s16 = smov 28  }
  0x18   : > { %v3045_v0 = vld [vmem:[%s3042_s19 + $0x18] sm:$0xff]   ;;  %v3048_v1 = vld [vmem:[%s3042_s19 + $0xc] sm:$0xff]   ;;  %v2650_v2 = vld [vmem:[%s3042_s19 + $0x14] ss:$0 sps:$4 sm:$0x11]   ;;  %s365_s15 = sadd.s32 %s2597_s14, %s2596_s26 }
  0x19   : > { %635 = vrot.lane.b32.xlu1 %v3045_v0, %s2944_s20  ;;  %v3054_v3 = vld [vmem:[%s3042_s19] sm:$0xff]   ;;  %633 = vrot.lane.b32.xlu0 %v3048_v1, %s2944_s20  ;;  %v591_v4 = vrot.slane %v3048_v1, 1  ;;  %v592_v5 = vrot.slane %v2650_v2, 1  ;;  %v2652_v6 = vld [vmem:[%s3042_s19 + $0x8] ss:$0 sps:$4 sm:$0x11]  }
  0x1a   : > { %v588_v7 = vrot.slane %v3054_v3, 1  ;;  %v476_v8 = vshrl.u32 %v3054_v3, 16  ;;  %v478_v9 = vshll.u32 %v3054_v3, 16  ;;  %v488_v10 = vshrl.u32 %v3048_v1, 16  ;;  %v3074_v30 = vld [vmem:[%s3042_s19 + $0x24] sm:$0xff]   ;;  %v3107_v50 = vld [vmem:[%s3042_s19 + $0x30] sm:$0xff]  }
  0x1b   : > { %v593_v11 = vsel %vm587_vm0, %v591_v4, %v592_v5  ;;  %v589_v12 = vrot.slane %v2652_v6, 1  ;;  %v483_v13 = vshll.u32 %v2652_v6, 16  ;;  %v2653_v14 = vld [vmem:[%s3042_s19 + $0x20] ss:$0 sps:$4 sm:$0x11]   ;;  %v490_v15 = vshll.u32 %v3048_v1, 16 }
  0x1c   : > { %v480_v16 = vrot.slane %v478_v9, 1  ;;  %v495_v17 = vshll.u32 %v2650_v2, 16  ;;  %v502_v18 = vshll.u32 %v3045_v0, 16  ;;  %v594_v23 = vrot.slane %v3045_v0, 1  ;;  %v3122_v60 = vld [vmem:[%s3042_s19 + $0x3c] sm:$0xff]   ;;  %s2387_s12 = sshll.u32 %s365_s15, 2 }
  0x1d   : > { %683 = vrot.lane.b32.xlu0 %v593_v11, %s2945_s21  ;;  %v590_v19 = vsel %vm587_vm0, %v588_v7, %v589_v12  ;;  %v485_v20 = vrot.slane %v483_v13, 1  ;;  %v492_v21 = vrot.slane %v490_v15, 1  ;;  %v500_v25 = vshrl.u32 %v3045_v0, 16  ;;  %v2655_v33 = vld [vmem:[%s3042_s19 + $0x2c] ss:$0 sps:$4 sm:$0x11]  }
  0x1e   : > { %612 = vrot.lane.b32.xlu1 %v590_v19, %s2946_s22  ;;  %v481_v22 = vor.u32 %v480_v16, %v476_v8  ;;  %v497_v24 = vrot.slane %v495_v17, 1  ;;  %v595_v26 = vrot.slane %v2653_v14, 1  ;;  %v504_v28 = vrot.slane %v502_v18, 1  ;;  %v2657_v52 = vld [vmem:[%s3042_s19 + $0x38] ss:$0 sps:$4 sm:$0x11]  }
  0x1f   : > { %v493_v27 = vor.u32 %v492_v21, %v488_v10  ;;  %v507_v29 = vshll.u32 %v2653_v14, 16  ;;  %v514_v37 = vshll.u32 %v3074_v30, 16  ;;  %v512_v39 = vshrl.u32 %v3074_v30, 16  ;;  %v2659_v2 = vld [vmem:[%s3042_s19 + $0x44] ss:$0 sps:$4 sm:$0x11]  }
  0x20   : > { %v486_v31 = vsel %vm474_vm1, %v481_v22, %v485_v20  ;;  %v596_v34 = vsel %vm587_vm0, %v594_v23, %v595_v26  ;;  %v505_v35 = vor.u32 %v504_v28, %v500_v25  ;;  %v519_v41 = vshll.u32 %v2655_v33, 16  ;;  %v3147_v14 = vld [vmem:[%s3042_s19 + $0x48] sm:$0xff]   ;;  %v2661_v16 = vld [vmem:[%s3042_s19 + $0x50] ss:$0 sps:$4 sm:$0x11]   ;;  %v3160_v23 = vld [vmem:[%s3042_s19 + $0x54] sm:$0xff]  }
  0x21   : > { %571 = vrot.lane.b32.xlu0 %v486_v31, %s2947_s23  ;;  %v498_v32 = vsel %vm474_vm1, %v493_v27, %v497_v24  ;;  %v509_v36 = vrot.slane %v507_v29, 1  ;;  %v516_v40 = vrot.slane %v514_v37, 1  ;;  %v597_v47 = vrot.slane %v3074_v30, 1  ;;  %v2663_v27 = vld [vmem:[%s3042_s19 + $0x5c] ss:$0 sps:$4 sm:$0x11]  }
  0x22   : > { %614 = vrot.lane.b32.xlu1 %v593_v11, %s2946_s22  ;;  %v521_v43 = vrot.slane %v519_v41, 1  ;;  %v598_v48 = vrot.slane %v2655_v33, 1  ;;  %v526_v53 = vshll.u32 %v3107_v50, 16  ;;  %v524_v55 = vshrl.u32 %v3107_v50, 16 }
  0x23   : > { %v510_v38 = vsel %vm474_vm1, %v505_v35, %v509_v36  ;;  %v517_v42 = vor.u32 %v516_v40, %v512_v39  ;;  %v531_v57 = vshll.u32 %v2657_v52, 16  ;;  %v600_v62 = vrot.slane %v3107_v50, 1  ;;  %v2664_v39 = vld [vmem:[%s3042_s19 + $0x60] sm:$0xff]   ;;  %v2665_v41 = vld [vmem:[%s3042_s19 + $0x68] ss:$0 sps:$4 sm:$0x11]  }
  0x24   : > { %v599_v51 = vsel %vm587_vm0, %v597_v47, %v598_v48  ;;  %v528_v56 = vrot.slane %v526_v53, 1  ;;  %v601_v63 = vrot.slane %v2657_v52, 1  ;;  %v538_v4 = vshll.u32 %v3122_v60, 16  ;;  %v3196_v48 = vld [vmem:[%s3042_s19 + $0x6c] sm:$0xff]  }
  0x25   : > { %573 = vrot.lane.b32.xlu0 %v498_v32, %s2947_s23  ;;  %v522_v46 = vsel %vm474_vm1, %v517_v42, %v521_v43  ;;  %v533_v59 = vrot.slane %v531_v57, 1  ;;  %v536_v6 = vshrl.u32 %v3122_v60, 16  ;;  %v543_v8 = vshll.u32 %v2659_v2, 16 }
  0x26   : > { %685 = vrot.lane.b32.xlu1 %v596_v34, %s2945_s21  ;;  %v529_v58 = vor.u32 %v528_v56, %v524_v55  ;;  %v602_v5 = vsel %vm587_vm0, %v600_v62, %v601_v63  ;;  %v540_v7 = vrot.slane %v538_v4, 1  ;;  %v603_v12 = vrot.slane %v3122_v60, 1 }
  0x27   : > { %v545_v10 = vrot.slane %v543_v8, 1  ;;  %v604_v13 = vrot.slane %v2659_v2, 1  ;;  %v550_v17 = vshll.u32 %v3147_v14, 16  ;;  %v548_v18 = vshrl.u32 %v3147_v14, 16 }
  0x28   : > { %v534_v61 = vsel %vm474_vm1, %v529_v58, %v533_v59  ;;  %v541_v9 = vor.u32 %v540_v7, %v536_v6  ;;  %v555_v20 = vshll.u32 %v2661_v16, 16  ;;  %v606_v25 = vrot.slane %v3147_v14, 1 }
  0x29   : > { %664 = vrot.lane.b32.xlu0 %v498_v32, %s2948_s24  ;;  %v605_v15 = vsel %vm587_vm0, %v603_v12, %v604_v13  ;;  %v552_v19 = vrot.slane %v550_v17, 1  ;;  %v607_v26 = vrot.slane %v2661_v16, 1  ;;  %v562_v28 = vshll.u32 %v3160_v23, 16 }
  0x2a   : > { %666 = vrot.lane.b32.xlu1 %v510_v38, %s2948_s24  ;;  %v546_v11 = vsel %vm474_vm1, %v541_v9, %v545_v10  ;;  %v557_v22 = vrot.slane %v555_v20, 1  ;;  %v560_v31 = vshrl.u32 %v3160_v23, 16  ;;  %v567_v33 = vshll.u32 %v2663_v27, 16 }
  0x2b   : > { %v553_v21 = vor.u32 %v552_v19, %v548_v18  ;;  %v608_v29 = vsel %vm587_vm0, %v606_v25, %v607_v26  ;;  %v564_v32 = vrot.slane %v562_v28, 1  ;;  %v609_v37 = vrot.slane %v3160_v23, 1  ;;  %v2687_v28 = vld [vmem:[%s3968_s4] sm:$0x3f]  }
  0x2c   : > { %v569_v35 = vrot.slane %v567_v33, 1  ;;  %v655_v42 = vshll.u32 %v2664_v39, 16  ;;  %v653_v43 = vshrl.u32 %v2664_v39, 16  ;;  %v660_v45 = vshll.u32 %v2665_v41, 16  ;;  %2591 = vmatprep.subr.msk.bf16.mxu0 %vm1545_vm3, %v2687_v28  ;;  %2592 = vmatprep.subr.msk.bf16.mxu1 %vm1545_vm3, %v2687_v28 }
  0x2d   : > { %704 = vrot.lane.b32.xlu0 %v3045_v0, %s2949_s13  ;;  %v558_v24 = vsel %vm474_vm1, %v553_v21, %v557_v22  ;;  %v680_v49 = vrot.slane %v2664_v39, 1  ;;  %v681_v53 = vrot.slane %v2665_v41, 1  ;;  %v726_v54 = vshll.u32 %v3196_v48, 16 }
  0x2e   : > { %706 = vrot.lane.b32.xlu1 %v3074_v30, %s2949_s13  ;;  %v657_v44 = vrot.slane %v655_v42, 1  ;;  %v662_v47 = vrot.slane %v660_v45, 1  ;;  %v724_v59 = vshrl.u32 %v3196_v48, 16  ;;  %v751_v20 = vrot.slane %v3196_v48, 1 }
  0x2f   : > { %v3222_v63 = vsel %vm587_vm0, %v680_v49, %v681_v53  ;;  %v728_v2 = vrot.slane %v726_v54, 1 }
  0x31   : > { %735 = vrot.lane.b32.xlu0 %v510_v38, %s2950_s16  ;;  %v729_v17 = vor.u32 %v728_v2, %v724_v59 }
  0x32   : > { %737 = vrot.lane.b32.xlu1 %v522_v46, %s2950_s16 }
  0x35   : > { %754 = vrot.lane.b32.xlu0 %v596_v34, %s3973_s25 }
  0x36   : > { %575 = vrot.lane.b32.xlu1 %v510_v38, %s2947_s23  ;;  %v610_v38 = vrot.slane %v2663_v27, 1 }
  0x38   : > { %v611_v40 = vsel %vm587_vm0, %v609_v37, %v610_v38 }
  0x39   : > { %756 = vrot.lane.b32.xlu0 %v599_v51, %s3973_s25 }
  0x3a   : > { %577 = vrot.lane.b32.xlu1 %v522_v46, %s2947_s23 }
  0x3d   : > { %616 = vrot.lane.b32.xlu0 %v596_v34, %s2946_s22  ;;  %v565_v34 = vor.u32 %v564_v32, %v560_v31 }
  0x3e   : > { %618 = vrot.lane.b32.xlu1 %v599_v51, %s2946_s22 }
  0x3f   : > { %v570_v36 = vsel %vm474_vm1, %v565_v34, %v569_v35 }
  0x41   : > { %637 = vrot.lane.b32.xlu0 %v3074_v30, %s2944_s20 }
  0x42   : > { %639 = vrot.lane.b32.xlu1 %v3107_v50, %s2944_s20 }
  0x45   : > { %668 = vrot.lane.b32.xlu0 %v522_v46, %s2948_s24  ;;  %v658_v46 = vor.u32 %v657_v44, %v653_v43 }
  0x46   : > { %670 = vrot.lane.b32.xlu1 %v534_v61, %s2948_s24 }
  0x47   : > { %v663_v52 = vsel %vm474_vm1, %v658_v46, %v662_v47 }
  0x49   : > { %687 = vrot.lane.b32.xlu0 %v599_v51, %s2945_s21  ;;  %v3207_v51 = vld [vmem:[%s3042_s19 + $0x74] ss:$0 sps:$4 sm:$0x11]   ;;  %s2390_s19 = sshll.u32 %s3989_s28, 5 }
  0x4a   : > { %689 = vrot.lane.b32.xlu1 %v602_v5, %s2945_s21  ;;  %v731_v4 = vshll.u32 %v3207_v51, 16  ;;  %v752_v21 = vrot.slane %v3207_v51, 1 }
  0x4c   : > { %v733_v18 = vrot.slane %v731_v4, 1 }
  0x4d   : > { %708 = vrot.lane.b32.xlu0 %v3107_v50, %s2949_s13 }
  0x4e   : > { %710 = vrot.lane.b32.xlu1 %v3122_v60, %s2949_s13  ;;  %v734_v35 = vsel %vm474_vm1, %v729_v17, %v733_v18 }
  0x51   : > { %739 = vrot.lane.b32.xlu0 %v534_v61, %s2950_s16 }
  0x52   : > { %741 = vrot.lane.b32.xlu1 %v546_v11, %s2950_s16 }
  0x55   : > { %758 = vrot.lane.b32.xlu0 %v602_v5, %s3973_s25 }
  0x56   : > { %579 = vrot.lane.b32.xlu1 %v534_v61, %s2947_s23 }
  0x59   : > { %760 = vrot.lane.b32.xlu0 %v605_v15, %s3973_s25 }
  0x5a   : > { %581 = vrot.lane.b32.xlu1 %v546_v11, %s2947_s23 }
  0x5d   : > { %620 = vrot.lane.b32.xlu0 %v602_v5, %s2946_s22 }
  0x5e   : > { %622 = vrot.lane.b32.xlu1 %v605_v15, %s2946_s22 }
  0x61   : > { %641 = vrot.lane.b32.xlu0 %v3122_v60, %s2944_s20 }
  0x62   : > { %643 = vrot.lane.b32.xlu1 %v3147_v14, %s2944_s20 }
  0x65   : > { %672 = vrot.lane.b32.xlu0 %v546_v11, %s2948_s24 }
  0x66   : > { %674 = vrot.lane.b32.xlu1 %v558_v24, %s2948_s24 }
  0x69   : > { %691 = vrot.lane.b32.xlu0 %v605_v15, %s2945_s21 }
  0x6a   : > { %693 = vrot.lane.b32.xlu1 %v608_v29, %s2945_s21 }
  0x6d   : > { %712 = vrot.lane.b32.xlu0 %v3147_v14, %s2949_s13 }
  0x6e   : > { %714 = vrot.lane.b32.xlu1 %v3160_v23, %s2949_s13 }
  0x71   : > { %743 = vrot.lane.b32.xlu0 %v558_v24, %s2950_s16 }
  0x72   : > { %745 = vrot.lane.b32.xlu1 %v570_v36, %s2950_s16 }
  0x75   : > { %762 = vrot.lane.b32.xlu0 %v608_v29, %s3973_s25 }
  0x76   : > { %583 = vrot.lane.b32.xlu1 %v558_v24, %s2947_s23 }
  0x79   : > { %764 = vrot.lane.b32.xlu0 %v611_v40, %s3973_s25  ;;  %s3201_s25 = scalar_lea.vmem %s3965_s1, %s2387_s12  ;;  %s2953_s12 = smov 124  }
  0x7a   : > { %585 = vrot.lane.b32.xlu1 %v570_v36, %s2947_s23  ;;  %v1243_v55 = vld [vmem:[%s3201_s25] sm:$0xf]  ;;  %v1244_v56 = vld [vmem:[%s3201_s25 + $0x4] sm:$0xf]  ;;  %v1246_v57 = vld [vmem:[%s3201_s25 + $0xc] sm:$0xf] }
  0x7b   : > { %v1247_v58 = vld [vmem:[%s3201_s25 + $0x10] sm:$0xf]  ;;  %v1245_v61 = vld [vmem:[%s3201_s25 + $0x8] sm:$0x1]  ;;  %v3219_v62 = vcombine.low %v1243_v55, %v1244_v56  ;;  %v1248_v5 = vld [vmem:[%s3201_s25 + $0x14] sm:$0x1] }
  0x7c   : > { %v3226_v6 = vcombine.low %v1246_v57, %v1247_v58  ;;  %v3229_v7 = vcombine.low %v1245_v61, %v1245_v61  ;;  %v1249_v8 = vld [vmem:[%s3201_s25 + $0x18] sm:$0xf]  ;;  %v1250_v9 = vld [vmem:[%s3201_s25 + $0x1c] sm:$0xf]  ;;  %v3240_v13 = vcombine.low %v1248_v5, %v1248_v5  ;;  %v1252_v15 = vld [vmem:[%s3201_s25 + $0x24] sm:$0xf] }
  0x7d   : > { %624 = vrot.lane.b32.xlu0 %v608_v29, %s2946_s22  ;;  %v1334_v12 = vshll.u32 %v3219_v62, 16  ;;  %v1253_v16 = vld [vmem:[%s3201_s25 + $0x28] sm:$0xf]  ;;  %v1332_v22 = vshrl.u32 %v3219_v62, 16  ;;  %v3248_v24 = vcombine.low %v1249_v8, %v1250_v9  ;;  %v1251_v33 = vld [vmem:[%s3201_s25 + $0x20] sm:$0x1] }
  0x7e   : > { %626 = vrot.lane.b32.xlu1 %v611_v40, %s2946_s22  ;;  %v1346_v19 = vshll.u32 %v3226_v6, 16  ;;  %v1339_v25 = vshll.u32 %v3229_v7, 16  ;;  %v1344_v26 = vshrl.u32 %v3226_v6, 16  ;;  %v3253_v27 = vcombine.low %v1252_v15, %v1253_v16  ;;  %v1254_v34 = vld [vmem:[%s3201_s25 + $0x2c] sm:$0x1] }
  0x7f   : > { %v1336_v31 = vrot.slane %v1334_v12, 1  ;;  %v1351_v32 = vshll.u32 %v3240_v13, 16  ;;  %v1255_v37 = vld [vmem:[%s3201_s25 + $0x30] sm:$0xf]  ;;  %v1256_v38 = vld [vmem:[%s3201_s25 + $0x34] sm:$0xf]  ;;  %v3275_v42 = vcombine.low %v1251_v33, %v1251_v33  ;;  %v3277_v43 = vcombine.low %v1254_v34, %v1254_v34 }
  0x80   : > { %v1358_v41 = vshll.u32 %v3248_v24, 16  ;;  %v1370_v44 = vshll.u32 %v3253_v27, 16  ;;  %v1258_v45 = vld [vmem:[%s3201_s25 + $0x3c] sm:$0xf]  ;;  %v1259_v46 = vld [vmem:[%s3201_s25 + $0x40] sm:$0xf]  ;;  %v3283_v49 = vcombine.low %v1255_v37, %v1256_v38 }
  0x81   : > { %645 = vrot.lane.b32.xlu0 %v3160_v23, %s2944_s20  ;;  %v1337_v47 = vor.u32 %v1336_v31, %v1332_v22  ;;  %v1353_v54 = vrot.slane %v1351_v32, 1  ;;  %v1356_v56 = vshrl.u32 %v3248_v24, 16  ;;  %v1257_v58 = vld [vmem:[%s3201_s25 + $0x38] sm:$0x1]  ;;  %v3290_v59 = vcombine.low %v1258_v45, %v1259_v46  ;;  %v1260_v8 = vld [vmem:[%s3201_s25 + $0x44] sm:$0x1] }
  0x82   : > { %647 = vrot.lane.b32.xlu1 %v2664_v39, %s2944_s20  ;;  %v1360_v57 = vrot.slane %v1358_v41, 1  ;;  %v1363_v61 = vshll.u32 %v3275_v42, 16  ;;  %v1368_v2 = vshrl.u32 %v3253_v27, 16  ;;  %v1372_v4 = vrot.slane %v1370_v44, 1  ;;  %v1261_v41 = vld [vmem:[%s3201_s25 + $0x48] sm:$0xf] }
  0x83   : > { %v1375_v5 = vshll.u32 %v3277_v43, 16  ;;  %v1443_v12 = vrot.slane %v3219_v62, 1  ;;  %v1444_v15 = vrot.slane %v3229_v7, 1  ;;  %v1382_v16 = vshll.u32 %v3283_v49, 16  ;;  %v1262_v44 = vld [vmem:[%s3201_s25 + $0x4c] sm:$0xf] }
  0x84   : > { %v1446_v18 = vrot.slane %v3226_v6, 1  ;;  %v3310_v22 = vcombine.low %v1260_v8, %v1260_v8  ;;  %v1361_v7 = vor.u32 %v1360_v57, %v1356_v56  ;;  %v1380_v32 = vshrl.u32 %v3283_v49, 16 }
  0x85   : > { %676 = vrot.lane.b32.xlu0 %v570_v36, %s2948_s24  ;;  %v1348_v36 = vrot.slane %v1346_v19, 1  ;;  %v1447_v19 = vrot.slane %v3240_v13, 1  ;;  %v1377_v31 = vrot.slane %v1375_v5, 1  ;;  %v1445_v13 = vsel %vm587_vm0, %v1443_v12, %v1444_v15  ;;  %v1263_v5 = vld [vmem:[%s3201_s25 + $0x50] sm:$0x1] }
  0x86   : > { %678 = vrot.lane.b32.xlu1 %v663_v52, %s2948_s24  ;;  %v1384_v33 = vrot.slane %v1382_v16, 1  ;;  %v1392_v38 = vshrl.u32 %v3290_v59, 16  ;;  %v1449_v56 = vrot.slane %v3248_v24, 1  ;;  %v1450_v57 = vrot.slane %v3275_v42, 1 }
  0x87   : > { %v1349_v53 = vor.u32 %v1348_v36, %v1344_v26  ;;  %v1365_v26 = vrot.slane %v1363_v61, 1  ;;  %v1448_v36 = vsel %vm587_vm0, %v1446_v18, %v1447_v19  ;;  %v1452_v61 = vrot.slane %v3253_v27, 1 }
  0x89   : > { %695 = vrot.lane.b32.xlu0 %v611_v40, %s2945_s21 }
  0x8a   : > { %697 = vrot.lane.b32.xlu1 %v3222_v63, %s2945_s21  ;;  %s3975_s21 = smov 32  }
  0x8b   : > { %v3235_v10 = vpop.permute.xlu1 %635  ;;  %v3237_v11 = vpop.permute.xlu0 %633 }
  0x8d   : > { %716 = vrot.lane.b32.xlu0 %v2664_v39, %s2949_s13  ;;  %v3268_v39 = vsel %vm1545_vm3, %v2687_v28, 0  ;;  %v1373_v28 = vor.u32 %v1372_v4, %v1368_v2  ;;  %v1453_v2 = vrot.slane %v3277_v43, 1  ;;  %v1385_v4 = vor.u32 %v1384_v33, %v1380_v32 }
  0x8e   : > { %718 = vrot.lane.b32.xlu1 %v3196_v48, %s2949_s13  ;;  %2589 = vmatpush3.bf16.msra.mxu1 %v3268_v39  ;;  %v1341_v48 = vrot.slane %v1339_v25, 1  ;;  %v1394_v25 = vshll.u32 %v3290_v59, 16  ;;  %v1455_v32 = vrot.slane %v3283_v49, 1  ;;  %s2952_s13 = smov 120  }
  0x8f   : > { %v3260_v29 = vpop.permute.xlu0 %683 }
  0x90   : > { %v3270_v40 = vpop.permute.xlu1 %612  ;;  %v1342_v9 = vsel %vm474_vm1, %v1337_v47, %v1341_v48  ;;  %v1396_v46 = vrot.slane %v1394_v25, 1  ;;  %v1399_v47 = vshll.u32 %v3310_v22, 16  ;;  %v1264_v48 = vld [vmem:[%s3201_s25 + $0x54] sm:$0xf] }
  0x91   : > { %747 = vrot.lane.b32.xlu0 %v663_v52, %s2950_s16  ;;  %v753_v52 = vsel %vm587_vm0, %v751_v20, %v752_v21  ;;  %v3306_v20 = vcombine.low %v1257_v58, %v1257_v58  ;;  %v3337_v58 = vcombine.low %v1261_v41, %v1262_v44 }
  0x92   : > { %749 = vrot.lane.b32.xlu1 %v734_v35, %s2950_s16  ;;  %v1397_v15 = vor.u32 %v1396_v46, %v1392_v38  ;;  %v1401_v16 = vrot.slane %v1399_v47, 1 }
  0x93   : > { %v572_v51 = vpop.permute.xlu0 %571  ;;  %v1387_v37 = vshll.u32 %v3306_v20, 16  ;;  %v1406_v18 = vshll.u32 %v3337_v58, 16  ;;  %v1456_v33 = vrot.slane %v3306_v20, 1 }
  0x94   : > { %v3286_v55 = vpop.permute.xlu1 %614  ;;  %v772_v34 = vsel %vm770_vm4, %v3054_v3, %v572_v51  ;;  %v1366_v3 = vsel %vm474_vm1, %v1361_v7, %v1365_v26  ;;  %v1378_v51 = vsel %vm474_vm1, %v1373_v28, %v1377_v31 }
  0x95   : > { %766 = vrot.lane.b32.xlu0 %v3222_v63, %s3975_s21  ;;  %v1354_v63 = vsel %vm474_vm1, %v1349_v53, %v1353_v54  ;;  %v789_v54 = vsel %vm787_vm5, %v772_v34, %v3270_v40  ;;  %v1389_v12 = vrot.slane %v1387_v37, 1  ;;  %v1408_v41 = vrot.slane %v1406_v18, 1 }
  0x96   : > { %768 = vrot.lane.b32.xlu1 %v753_v52, %s3975_s21  ;;  %v1265_v52 = vld [vmem:[%s3201_s25 + $0x58] sm:$0xf]  ;;  %v806_v42 = vsel %vm804_vm6, %v789_v54, %v3237_v11  ;;  %v1454_v11 = vsel %vm587_vm0, %v1452_v61, %v1453_v2 }
  0x97   : > { %v574_v17 = vpop.permute.xlu0 %573  ;;  %v3342_v8 = vcombine.low %v1264_v48, %v1265_v52  ;;  %v1390_v31 = vsel %vm474_vm1, %v1385_v4, %v1389_v12 }
  0x98   : > { %v3308_v21 = vpop.permute.xlu1 %685  ;;  %v774_v53 = vsel %vm770_vm4, %v3048_v1, %v574_v17  ;;  %v1266_v17 = vld [vmem:[%s3201_s25 + $0x5c] sm:$0x1] }
  0x99   : > { %1427 = vrot.lane.b32.xlu0 %v1342_v9, %s2947_s23  ;;  %v791_v40 = vsel %vm787_vm5, %v774_v53, %v3286_v55  ;;  %v2454_v55 = vcombine.low %v1263_v5, %v1263_v5  ;;  %v2455_v7 = vcombine.low %v1266_v17, %v1266_v17  ;;  %v1418_v26 = vshll.u32 %v3342_v8, 16 }
  0x9a   : > { %1429 = vrot.lane.b32.xlu1 %v1354_v63, %s2947_s23  ;;  %v1451_v63 = vsel %vm587_vm0, %v1449_v56, %v1450_v57  ;;  %v808_v19 = vsel %vm804_vm6, %v791_v40, %v3235_v10  ;;  %v1458_v10 = vrot.slane %v3290_v59, 1  ;;  %v1461_v40 = vrot.slane %v3337_v58, 1 }
  0x9b   : > { %v665_v35 = vpop.permute.xlu0 %664  ;;  %v1411_v44 = vshll.u32 %v2454_v55, 16  ;;  %v1420_v47 = vrot.slane %v1418_v26, 1  ;;  %v1423_v48 = vshll.u32 %v2455_v7, 16  ;;  %v1465_v17 = vrot.slane %v2455_v7, 1 }
  0x9c   : > { %v667_v45 = vpop.permute.xlu1 %666  ;;  %v823_v43 = vsel %vm821_vm7, %v806_v42, %v665_v35  ;;  %v1459_v35 = vrot.slane %v3310_v22, 1 }
  0x9d   : > { %1467 = vrot.lane.b32.xlu0 %v1445_v13, %s2946_s22  ;;  %v1402_v13 = vsel %vm474_vm1, %v1397_v15, %v1401_v16  ;;  %v840_v34 = vsel %vm838_vm8, %v823_v43, %v3260_v29  ;;  %v825_v37 = vsel %vm821_vm7, %v808_v19, %v667_v45  ;;  %v1416_v29 = vshrl.u32 %v3342_v8, 16 }
  0x9e   : > { %1469 = vrot.lane.b32.xlu1 %v1448_v36, %s2946_s22  ;;  %v1404_v36 = vshrl.u32 %v3337_v58, 16  ;;  %v842_v53 = vsel %vm838_vm8, %v825_v37, %v3308_v21  ;;  %v1413_v54 = vrot.slane %v1411_v44, 1  ;;  %v1425_v2 = vrot.slane %v1423_v48, 1 }
  0x9f   : > { %v705_v1 = vpop.permute.xlu0 %704  ;;  %v1421_v61 = vor.u32 %v1420_v47, %v1416_v29  ;;  %v1464_v16 = vrot.slane %v3342_v8, 1 }
  0xa0   : > { %v707_v9 = vpop.permute.xlu1 %706  ;;  %v857_v38 = vsel %vm855_vm9, %v840_v34, %v705_v1  ;;  %v1460_v1 = vsel %vm587_vm0, %v1458_v10, %v1459_v35 }
  0xa1   : > { %1431 = vrot.lane.b32.xlu0 %v1366_v3, %s2947_s23  ;;  %v859_v45 = vsel %vm855_vm9, %v842_v53, %v707_v9  ;;  %v1457_v3 = vsel %vm587_vm0, %v1455_v32, %v1456_v33  ;;  %v1462_v9 = vrot.slane %v2454_v55, 1  ;;  %v1426_v15 = vsel %vm474_vm1, %v1421_v61, %v1425_v2 }
  0xa2   : > { %1433 = vrot.lane.b32.xlu1 %v1378_v51, %s2947_s23  ;;  %v1409_v51 = vor.u32 %v1408_v41, %v1404_v36  ;;  %v1466_v18 = vsel %vm587_vm0, %v1464_v16, %v1465_v17 }
  0xa3   : > { %v736_v25 = vpop.permute.xlu0 %735  ;;  %v1463_v43 = vsel %vm587_vm0, %v1461_v40, %v1462_v9 }
  0xa4   : > { %v738_v28 = vpop.permute.xlu1 %737  ;;  %v874_v20 = vsel %vm872_vm10, %v857_v38, %v736_v25  ;;  %v1414_v5 = vsel %vm474_vm1, %v1409_v51, %v1413_v54 }
  0xa5   : > { %1471 = vrot.lane.b32.xlu0 %v1451_v63, %s2946_s22  ;;  %v876_v56 = vsel %vm872_vm10, %v859_v45, %v738_v28 }
  0xa6   : > { %1473 = vrot.lane.b32.xlu1 %v1454_v11, %s2946_s22 }
  0xa7   : > { %v755_v46 = vpop.permute.xlu0 %754 }
  0xa8   : > { %v576_v52 = vpop.permute.xlu1 %575  ;;  %v891_v22 = vsel %vm889_vm11, %v874_v20, %v755_v46 }
  0xa9   : > { %2536 = vmatprep.mubr.msk.bf16.mxu0 %vm933_vm12, %v891_v22  ;;  %1435 = vrot.lane.b32.xlu0 %v1390_v31, %s2947_s23  ;;  %v776_v28 = vsel %vm770_vm4, %v3045_v0, %v576_v52 }
  0xaa   : > { %1437 = vrot.lane.b32.xlu1 %v1402_v13, %s2947_s23 }
  0xab   : > { %v757_v57 = vpop.permute.xlu0 %756 }
  0xac   : > { %v578_v21 = vpop.permute.xlu1 %577  ;;  %v893_v4 = vsel %vm889_vm11, %v876_v56, %v757_v57 }
  0xad   : > { %2537 = vmatmul.mubr.msk.bf16.vlgmr.msra.gmra.mrb[0].mxu0 %vm933_vm12, %v893_v4  ;;  %1475 = vrot.lane.b32.xlu0 %v1457_v3, %s2946_s22  ;;  %v778_v10 = vsel %vm770_vm4, %v3074_v30, %v578_v21 }
  0xae   : > { %1477 = vrot.lane.b32.xlu1 %v1460_v1, %s2946_s22  ;;  %2553 = vmatpush3.bf16.msra.mxu0 %v3268_v39 }
  0xaf   : > { %v617_v12 = vpop.permute.xlu0 %616 }
  0xb0   : > { %v619_v42 = vpop.permute.xlu1 %618  ;;  %v793_v31 = vsel %vm787_vm5, %v776_v28, %v617_v12 }
  0xb1   : > { %1439 = vrot.lane.b32.xlu0 %v1414_v5, %s2947_s23  ;;  %v795_v36 = vsel %vm787_vm5, %v778_v10, %v619_v42 }
  0xb2   : > { %1441 = vrot.lane.b32.xlu1 %v1426_v15, %s2947_s23 }
  0xb3   : > { %v638_v63 = vpop.permute.xlu0 %637 }
  0xb4   : > { %v640_v19 = vpop.permute.xlu1 %639  ;;  %v810_v13 = vsel %vm804_vm6, %v793_v31, %v638_v63 }
  0xb5   : > { %1479 = vrot.lane.b32.xlu0 %v1463_v43, %s2946_s22  ;;  %v812_v38 = vsel %vm804_vm6, %v795_v36, %v640_v19 }
  0xb6   : > { %1481 = vrot.lane.b32.xlu1 %v1466_v18, %s2946_s22 }
  0xb7   : > { %v669_v39 = vpop.permute.xlu0 %668 }
  0xb8   : > { %v671_v55 = vpop.permute.xlu1 %670  ;;  %v827_v33 = vsel %vm821_vm7, %v810_v13, %v669_v39 }
  0xb9   : > { %v829_v44 = vsel %vm821_vm7, %v812_v38, %v671_v55 }
  0xbb   : > { %v688_v25 = vpop.permute.xlu0 %687 }
  0xbc   : > { %v690_v11 = vpop.permute.xlu1 %689  ;;  %v844_v35 = vsel %vm838_vm8, %v827_v33, %v688_v25 }
  0xbd   : > { %v846_v29 = vsel %vm838_vm8, %v829_v44, %v690_v11 }
  0xbf   : > { %v709_v7 = vpop.permute.xlu0 %708 }
  0xc0   : > { %v711_v26 = vpop.permute.xlu1 %710  ;;  %v861_v37 = vsel %vm855_vm9, %v844_v35, %v709_v7 }
  0xc1   : > { %v863_v30 = vsel %vm855_vm9, %v846_v29, %v711_v26 }
  0xc3   : > { %v740_v32 = vpop.permute.xlu0 %739 }
  0xc4   : > { %v742_v34 = vpop.permute.xlu1 %741  ;;  %v878_v0 = vsel %vm872_vm10, %v861_v37, %v740_v32 }
  0xc5   : > { %v880_v47 = vsel %vm872_vm10, %v863_v30, %v742_v34 }
  0xc7   : > { %v759_v41 = vpop.permute.xlu0 %758 }
  0xc8   : > { %v580_v20 = vpop.permute.xlu1 %579  ;;  %v895_v46 = vsel %vm889_vm11, %v878_v0, %v759_v41 }
  0xc9   : > { %2540 = vmatprep.mubr.msk.bf16.mxu0 %vm933_vm12, %v895_v46  ;;  %v780_v21 = vsel %vm770_vm4, %v3107_v50, %v580_v20 }
  0xcb   : > { %v761_v48 = vpop.permute.xlu0 %760 }
  0xcc   : > { %v582_v52 = vpop.permute.xlu1 %581  ;;  %v897_v22 = vsel %vm889_vm11, %v880_v47, %v761_v48 }
  0xcd   : > { %2541 = vmatmul.mubr.msk.bf16.gmra.mrb[4].mxu0 %vm933_vm12, %v897_v22  ;;  %v782_v15 = vsel %vm770_vm4, %v3122_v60, %v582_v52 }
  0xcf   : > { %v621_v53 = vpop.permute.xlu0 %620 }
  0xd0   : > { %v623_v45 = vpop.permute.xlu1 %622  ;;  %v797_v4 = vsel %vm787_vm5, %v780_v21, %v621_v53 }
  0xd1   : > { %v799_v17 = vsel %vm787_vm5, %v782_v15, %v623_v45 }
  0xd3   : > { %v642_v3 = vpop.permute.xlu0 %641 }
  0xd4   : > { %v644_v51 = vpop.permute.xlu1 %643  ;;  %v814_v5 = vsel %vm804_vm6, %v797_v4, %v642_v3 }
  0xd5   : > { %v816_v43 = vsel %vm804_vm6, %v799_v17, %v644_v51 }
  0xd7   : > { %v673_v54 = vpop.permute.xlu0 %672 }
  0xd8   : > { %v675_v56 = vpop.permute.xlu1 %674  ;;  %v831_v9 = vsel %vm821_vm7, %v814_v5, %v673_v54 }
  0xd9   : > { %v833_v18 = vsel %vm821_vm7, %v816_v43, %v675_v56 }
  0xdb   : > { %v692_v57 = vpop.permute.xlu0 %691 }
  0xdc   : > { %v694_v1 = vpop.permute.xlu1 %693  ;;  %v848_v16 = vsel %vm838_vm8, %v831_v9, %v692_v57 }
  0xdd   : > { %v850_v55 = vsel %vm838_vm8, %v833_v18, %v694_v1 }
  0xdf   : > { %v713_v61 = vpop.permute.xlu0 %712 }
  0xe0   : > { %v715_v2 = vpop.permute.xlu1 %714  ;;  %v865_v42 = vsel %vm855_vm9, %v848_v16, %v713_v61 }
  0xe1   : > { %v867_v60 = vsel %vm855_vm9, %v850_v55, %v715_v2 }
  0xe3   : > { %v744_v40 = vpop.permute.xlu0 %743 }
  0xe4   : > { %v746_v12 = vpop.permute.xlu1 %745  ;;  %v882_v50 = vsel %vm872_vm10, %v865_v42, %v744_v40 }
  0xe5   : > { %v884_v25 = vsel %vm872_vm10, %v867_v60, %v746_v12 }
  0xe7   : > { %v763_v63 = vpop.permute.xlu0 %762 }
  0xe8   : > { %v584_v19 = vpop.permute.xlu1 %583  ;;  %v899_v39 = vsel %vm889_vm11, %v882_v50, %v763_v63 }
  0xe9   : > { %2544 = vmatprep.mubr.msk.bf16.mxu0 %vm933_vm12, %v899_v39  ;;  %v784_v38 = vsel %vm770_vm4, %v3147_v14, %v584_v19 }
  0xeb   : > { %v765_v11 = vpop.permute.xlu0 %764 }
  0xec   : > { %v586_v7 = vpop.permute.xlu1 %585  ;;  %v901_v26 = vsel %vm889_vm11, %v884_v25, %v765_v11 }
  0xed   : > { %2545 = vmatmul.mubr.msk.bf16.gmra.mrb[8].mxu0 %vm933_vm12, %v901_v26  ;;  %v786_v0 = vsel %vm770_vm4, %v3160_v23, %v586_v7 }
  0xef   : > { %v625_v28 = vpop.permute.xlu0 %624 }
  0xf0   : > { %v627_v31 = vpop.permute.xlu1 %626  ;;  %v801_v41 = vsel %vm787_vm5, %v784_v38, %v625_v28  ;;  %v2412_v28 = vld [vmem:[%s3967_s3] ss:$0 sm:$0xff] }
  0xf1   : > { %v803_v44 = vsel %vm787_vm5, %v786_v0, %v627_v31 }
  0xf3   : > { %v646_v13 = vpop.permute.xlu0 %645 }
  0xf4   : > { %v648_v32 = vpop.permute.xlu1 %647  ;;  %v818_v20 = vsel %vm804_vm6, %v801_v41, %v646_v13 }
  0xf5   : > { %v820_v29 = vsel %vm804_vm6, %v803_v44, %v648_v32 }
  0xf7   : > { %v677_v33 = vpop.permute.xlu0 %676 }
  0xf8   : > { %v679_v34 = vpop.permute.xlu1 %678  ;;  %v835_v30 = vsel %vm821_vm7, %v818_v20, %v677_v33 }
  0xf9   : > { %v837_v48 = vsel %vm821_vm7, %v820_v29, %v679_v34 }
  0xfb   : > { %v696_v10 = vpop.permute.xlu0 %695 }
  0xfc   : > { %v698_v35 = vpop.permute.xlu1 %697  ;;  %v852_v52 = vsel %vm838_vm8, %v835_v30, %v696_v10 }
  0xfd   : > { %v854_v14 = vsel %vm838_vm8, %v837_v48, %v698_v35 }
  0xff   : > { %v717_v36 = vpop.permute.xlu0 %716 }
 0x100   : > { %v719_v37 = vpop.permute.xlu1 %718  ;;  %v869_v23 = vsel %vm855_vm9, %v852_v52, %v717_v36 }
 0x101   : > { %v871_v22 = vsel %vm855_vm9, %v854_v14, %v719_v37 }
 0x103   : > { %v748_v46 = vpop.permute.xlu0 %747 }
 0x104   : > { %v750_v47 = vpop.permute.xlu1 %749  ;;  %v886_v53 = vsel %vm872_vm10, %v869_v23, %v748_v46 }
 0x105   : > { %v888_v3 = vsel %vm872_vm10, %v871_v22, %v750_v47 }
 0x107   : > { %v767_v45 = vpop.permute.xlu0 %766 }
 0x108   : > { %v769_v51 = vpop.permute.xlu1 %768  ;;  %v903_v54 = vsel %vm889_vm11, %v886_v53, %v767_v45 }
 0x109   : > { %v905_v56 = vsel %vm889_vm11, %v888_v3, %v769_v51  ;;  %2548 = vmatprep.mubr.msk.bf16.mxu0 %vm933_vm12, %v903_v54 }
 0x10a   : > { %2549 = vmatmul.mubr.msk.bf16.gmra.mrb[12].mxu0 %vm933_vm12, %v905_v56 }
 0x10b   : > { %v1428_v57 = vpop.permute.xlu0 %1427 }
 0x10c   : > { %v1430_v1 = vpop.permute.xlu1 %1429  ;;  %v1484_v61 = vsel %vm770_vm4, %v3219_v62, %v1428_v57 }
 0x10d   : > { %v1486_v2 = vsel %vm770_vm4, %v3226_v6, %v1430_v1 }
 0x10f   : > { %v1468_v21 = vpop.permute.xlu0 %1467 }
 0x110   : > { %v1500_v4 = vsel %vm787_vm5, %v1484_v61, %v1468_v21  ;;  %v1470_v5 = vpop.permute.xlu1 %1469 }
 0x111   : > { %v1502_v40 = vsel %vm787_vm5, %v1486_v2, %v1470_v5  ;;  %2554 = vmatprep.mubr.msk.bf16.mxu0 %vm804_vm6, %v1500_v4 }
 0x112   : > { %2555 = vmatmul.mubr.msk.bf16.vlgmr.msra.gmra.mrb[16].mxu0 %vm804_vm6, %v1502_v40 }
 0x113   : > { %v1432_v9 = vpop.permute.xlu0 %1431 }
 0x114   : > { %v1434_v12 = vpop.permute.xlu1 %1433  ;;  %v1488_v15 = vsel %vm770_vm4, %v3248_v24, %v1432_v9  ;;  %v3564_v9 = vld [vmem:[%s3969_s5] ss:$0 sm:$0xff] }
 0x115   : > { %v1490_v62 = vsel %vm770_vm4, %v3253_v27, %v1434_v12 }
 0x117   : > { %v1472_v16 = vpop.permute.xlu0 %1471 }
 0x118   : > { %v1474_v6 = vpop.permute.xlu1 %1473  ;;  %v1504_v17 = vsel %vm787_vm5, %v1488_v15, %v1472_v16 }
 0x119   : > { %v1506_v42 = vsel %vm787_vm5, %v1490_v62, %v1474_v6  ;;  %2558 = vmatprep.mubr.msk.bf16.mxu1 %vm804_vm6, %v1504_v17 }
 0x11a   : > { %2559 = vmatmul.mubr.msk.bf16.vlgmr.msra.gmra.mrb[0].mxu1 %vm804_vm6, %v1506_v42 }
 0x11b   : > { %v1436_v43 = vpop.permute.xlu0 %1435 }
 0x11c   : > { %v1438_v50 = vpop.permute.xlu1 %1437  ;;  %v1492_v63 = vsel %vm770_vm4, %v3283_v49, %v1436_v43 }
 0x11d   : > { %v1494_v24 = vsel %vm770_vm4, %v3290_v59, %v1438_v50 }
 0x11f   : > { %v1476_v18 = vpop.permute.xlu0 %1475 }
 0x120   : > { %v1508_v27 = vsel %vm787_vm5, %v1492_v63, %v1476_v18  ;;  %v1478_v19 = vpop.permute.xlu1 %1477 }
 0x121   : > { %v1510_v39 = vsel %vm787_vm5, %v1494_v24, %v1478_v19  ;;  %2562 = vmatprep.mubr.msk.bf16.mxu1 %vm804_vm6, %v1508_v27 }
 0x122   : > { %2563 = vmatmul.mubr.msk.bf16.gmra.mrb[4].mxu1 %vm804_vm6, %v1510_v39 }
 0x123   : > { %v1440_v55 = vpop.permute.xlu0 %1439 }
 0x124   : > { %v1442_v60 = vpop.permute.xlu1 %1441  ;;  %v1496_v25 = vsel %vm770_vm4, %v3337_v58, %v1440_v55 }
 0x125   : > { %v1498_v49 = vsel %vm770_vm4, %v3342_v8, %v1442_v60 }
 0x127   : > { %v1480_v11 = vpop.permute.xlu0 %1479 }
 0x128   : > { %v1512_v59 = vsel %vm787_vm5, %v1496_v25, %v1480_v11  ;;  %v1482_v7 = vpop.permute.xlu1 %1481 }
 0x129   : > { %v1514_v26 = vsel %vm787_vm5, %v1498_v49, %v1482_v7  ;;  %2566 = vmatprep.mubr.msk.bf16.mxu1 %vm804_vm6, %v1512_v59 }
 0x12a   : > { %2567 = vmatmul.mubr.msk.bf16.gmra.mrb[8].mxu1 %vm804_vm6, %v1514_v26 }
 0x180   : > { %v2538_v31 = vpop.f32.mrb[0].mxu0 }
 0x181   : > { %v988_v13 = vpop.f32.mrb[1].mxu0  ;;  %v3499_v34 = vadd.f32 %v2538_v31, %v2412_v28 }
 0x182   : > { %v3493_v58 = vadd.f32 %v2412_v28, %v988_v13  ;;  %v2539_v32 = vpop.f32.mrb[2].mxu0 }
 0x183   : > { %v991_v8 = vpop.f32.mrb[3].mxu0  ;;  %v3503_v10 = vadd.f32 %v2539_v32, %v2412_v28 }
 0x184   : > { %v3495_v33 = vadd.f32 %v2412_v28, %v991_v8  ;;  %1662 = vrot.lane.b32.xlu0 %v3493_v58, %s2952_s13 }
 0x186   : > { %1664 = vrot.lane.b32.xlu1 %v3495_v33, %s2952_s13 }
 0x188   : > { %1666 = vrot.lane.b32.xlu0 %v3499_v34, %s2952_s13 }
 0x18a   : > { %1668 = vrot.lane.b32.xlu1 %v3503_v10, %s2952_s13 }
 0x1a0   : > { %v2542_v35 = vpop.f32.mrb[4].mxu0 }
 0x1a1   : > { %v1004_v36 = vpop.f32.mrb[5].mxu0  ;;  %v3515_v44 = vadd.f32 %v2542_v35, %v2412_v28 }
 0x1a2   : > { %v3509_v37 = vadd.f32 %v2412_v28, %v1004_v36  ;;  %v2543_v38 = vpop.f32.mrb[6].mxu0 }
 0x1a3   : > { %v1007_v0 = vpop.f32.mrb[7].mxu0  ;;  %v3519_v20 = vadd.f32 %v2543_v38, %v2412_v28 }
 0x1a4   : > { %v3511_v41 = vadd.f32 %v2412_v28, %v1007_v0  ;;  %1670 = vrot.lane.b32.xlu0 %v3509_v37, %s2952_s13 }
 0x1a6   : > { %1672 = vrot.lane.b32.xlu1 %v3511_v41, %s2952_s13 }
 0x1a8   : > { %1674 = vrot.lane.b32.xlu0 %v3515_v44, %s2952_s13 }
 0x1aa   : > { %1676 = vrot.lane.b32.xlu1 %v3519_v20, %s2952_s13 }
 0x1c0   : > { %v2546_v46 = vpop.f32.mrb[8].mxu0 }
 0x1c1   : > { %v1020_v29 = vpop.f32.mrb[9].mxu0  ;;  %v3531_v14 = vadd.f32 %v2546_v46, %v2412_v28 }
 0x1c2   : > { %v3525_v30 = vadd.f32 %v2412_v28, %v1020_v29  ;;  %v2547_v47 = vpop.f32.mrb[10].mxu0 }
 0x1c3   : > { %v1023_v48 = vpop.f32.mrb[11].mxu0  ;;  %v3535_v23 = vadd.f32 %v2547_v47, %v2412_v28 }
 0x1c4   : > { %v3527_v52 = vadd.f32 %v2412_v28, %v1023_v48  ;;  %1678 = vrot.lane.b32.xlu0 %v3525_v30, %s2952_s13 }
 0x1c6   : > { %1680 = vrot.lane.b32.xlu1 %v3527_v52, %s2952_s13 }
 0x1c8   : > { %1682 = vrot.lane.b32.xlu0 %v3531_v14, %s2952_s13 }
 0x1ca   : > { %1684 = vrot.lane.b32.xlu1 %v3535_v23, %s2952_s13 }
 0x1dd   : > { %v2550_v22 = vpop.f32.mrb[12].mxu0 }
 0x1de   : > { %v1036_v53 = vpop.f32.mrb[13].mxu0  ;;  %v3547_v56 = vadd.f32 %v2550_v22, %v2412_v28 }
 0x1df   : > { %v3541_v45 = vadd.f32 %v2412_v28, %v1036_v53  ;;  %v2551_v3 = vpop.f32.mrb[14].mxu0 }
 0x1e0   : > { %v1039_v51 = vpop.f32.mrb[15].mxu0  ;;  %v3551_v57 = vadd.f32 %v2551_v3, %v2412_v28 }
 0x1e1   : > { %v3543_v54 = vadd.f32 %v2412_v28, %v1039_v51  ;;  %1686 = vrot.lane.b32.xlu0 %v3541_v45, %s2952_s13 }
 0x1e3   : > { %1688 = vrot.lane.b32.xlu1 %v3543_v54, %s2952_s13 }
 0x1e5   : > { %1690 = vrot.lane.b32.xlu0 %v3547_v56, %s2952_s13  ;;  %v2556_v1 = vpop.f32.mrb[16].mxu0 }
 0x1e6   : > { %v1583_v61 = vpop.f32.mrb[17].mxu0  ;;  %v1592_v43 = vadd.f32 %v2556_v1, %v3564_v9 }
 0x1e7   : > { %1692 = vrot.lane.b32.xlu1 %v3551_v57, %s2952_s13  ;;  %v2557_v2 = vpop.f32.mrb[18].mxu0  ;;  %v1584_v15 = vadd.f32 %v3564_v9, %v1583_v61  ;;  %v1926_v61 = vld [vmem:[%s3970_s6] sm:$0x3] }
 0x1e8   : > { %v1586_v21 = vpop.f32.mrb[19].mxu0  ;;  %v1595_v39 = vadd.f32 %v2557_v2, %v3564_v9  ;;  %2593 = vmatprep.subr.msk.bf16.mxu1 %vm950_vm2, %v1926_v61  ;;  %v1959_v2 = vsel %vm950_vm2, %v1926_v61, 0 }
 0x1e9   : > { %v1587_v62 = vadd.f32 %v3564_v9, %v1586_v21  ;;  %2571 = vmatpush3.bf16.msra.mxu1 %v1959_v2 }
 0x1ed   : > { %v3557_v4 = vpop.f32.mrb[0].mxu1 }
 0x1ee   : > { %v1599_v5 = vpop.f32.mrb[1].mxu1 }
 0x1ef   : > { %v3559_v40 = vpop.f32.mrb[2].mxu1 }
 0x1f0   : > { %v1602_v12 = vpop.f32.mrb[3].mxu1 }
 0x1f5   : > { %v2564_v16 = vpop.f32.mrb[4].mxu1 }
 0x1f6   : > { %v1663_v6 = vpop.permute.xlu0 %1662  ;;  %v3569_v17 = vadd.f32 %v2564_v16, %v3564_v9  ;;  %v1615_v42 = vpop.f32.mrb[5].mxu1  ;;  %v1603_v16 = vadd.f32 %v3564_v9, %v1602_v12 }
 0x1f7   : > { %v3572_v50 = vadd.f32 %v1663_v6, %v1584_v15  ;;  %v3575_v63 = vadd.f32 %v3564_v9, %v1615_v42  ;;  %v2565_v24 = vpop.f32.mrb[6].mxu1  ;;  %v1600_v15 = vadd.f32 %v3564_v9, %v1599_v5 }
 0x1f8   : > { %v1665_v18 = vpop.permute.xlu1 %1664  ;;  %v3578_v27 = vadd.f32 %v2565_v24, %v3564_v9  ;;  %v1618_v19 = vpop.f32.mrb[7].mxu1 }
 0x1f9   : > { %v2466_v55 = vmul.f32 -1.442695, %v3572_v50  ;;  %v3582_v60 = vadd.f32 %v1665_v18, %v1587_v62  ;;  %v3585_v25 = vadd.f32 %v3564_v9, %v1618_v19 }
 0x1fa   : > { %v1667_v49 = vpop.permute.xlu0 %1666 }
 0x1fb   : > { %2688 = vpow2.f32 %v2466_v55  ;;  %v2467_v11 = vmul.f32 -1.442695, %v3582_v60  ;;  %v3588_v59 = vadd.f32 %v1667_v49, %v1592_v43  ;;  %v1608_v43 = vadd.f32 %v3557_v4, %v3564_v9 }
 0x1fc   : > { %v1669_v7 = vpop.permute.xlu1 %1668 }
 0x1fd   : > { %2690 = vpow2.f32 %v2467_v11  ;;  %v2468_v26 = vmul.f32 -1.442695, %v3588_v59  ;;  %v3591_v28 = vadd.f32 %v1669_v7, %v1595_v39  ;;  %v2568_v31 = vpop.f32.mrb[8].mxu1  ;;  %v1611_v39 = vadd.f32 %v3559_v40, %v3564_v9 }
 0x1fe   : > { %v3594_v13 = vadd.f32 %v2568_v31, %v3564_v9  ;;  %v1631_v32 = vpop.f32.mrb[9].mxu1 }
 0x1ff   : > { %2692 = vpow2.f32 %v2468_v26  ;;  %v2469_v8 = vmul.f32 -1.442695, %v3591_v28  ;;  %v3598_v35 = vadd.f32 %v3564_v9, %v1631_v32  ;;  %v2569_v36 = vpop.f32.mrb[10].mxu1 }
 0x200   : > { %v3601_v38 = vadd.f32 %v2569_v36, %v3564_v9  ;;  %v1634_v0 = vpop.f32.mrb[11].mxu1 }
 0x201   : > { %2694 = vpow2.f32 %v2469_v8  ;;  %v3604_v46 = vadd.f32 %v3564_v9, %v1634_v0 }
 0x205   : > { %v2689_v29 = vpop.eup %2688 }
 0x206   : > { %v1790_v47 = vadd.f32 1.0, %v2689_v29 }
 0x207   : > { %v2691_v48 = vpop.eup %2690 }
 0x208   : > { %2696 = vrcp.f32 %v1790_v47  ;;  %v1791_v22 = vadd.f32 1.0, %v2691_v48 }
 0x209   : > { %v2693_v53 = vpop.eup %2692 }
 0x20a   : > { %2698 = vrcp.f32 %v1791_v22  ;;  %v1792_v3 = vadd.f32 1.0, %v2693_v53 }
 0x20b   : > { %v2695_v51 = vpop.eup %2694 }
 0x20c   : > { %2700 = vrcp.f32 %v1792_v3  ;;  %v1793_v1 = vadd.f32 1.0, %v2695_v51 }
 0x20e   : > { %2702 = vrcp.f32 %v1793_v1 }
 0x212   : > { %v2697_v21 = vpop.eup %2696 }
 0x213   : > { %1854 = vrot.lane.b32.xlu0 %v2697_v21, %s2953_s12 }
 0x214   : > { %v2699_v62 = vpop.eup %2698 }
 0x215   : > { %1856 = vrot.lane.b32.xlu1 %v2699_v62, %s2953_s12 }
 0x216   : > { %v2701_v6 = vpop.eup %2700  ;;  %v1671_v42 = vpop.permute.xlu0 %1670 }
 0x217   : > { %v3617_v24 = vadd.f32 %v1671_v42, %v1600_v15  ;;  %1858 = vrot.lane.b32.xlu0 %v2701_v6, %s2953_s12 }
 0x218   : > { %v2703_v18 = vpop.eup %2702  ;;  %v1673_v19 = vpop.permute.xlu1 %1672 }
 0x219   : > { %v2470_v5 = vmul.f32 -1.442695, %v3617_v24  ;;  %v3623_v55 = vadd.f32 %v1673_v19, %v1603_v16  ;;  %1860 = vrot.lane.b32.xlu1 %v2703_v18, %s2953_s12 }
 0x21a   : > { %v1675_v12 = vpop.permute.xlu0 %1674 }
 0x21b   : > { %2704 = vpow2.f32 %v2470_v5  ;;  %v2471_v49 = vmul.f32 -1.442695, %v3623_v55  ;;  %v3627_v4 = vadd.f32 %v1675_v12, %v1608_v43 }
 0x21c   : > { %v1677_v11 = vpop.permute.xlu1 %1676 }
 0x21d   : > { %2706 = vpow2.f32 %v2471_v49  ;;  %v2472_v7 = vmul.f32 -1.442695, %v3627_v4  ;;  %v3630_v26 = vadd.f32 %v1677_v11, %v1611_v39 }
 0x21f   : > { %2708 = vpow2.f32 %v2472_v7  ;;  %v2473_v40 = vmul.f32 -1.442695, %v3630_v26 }
 0x221   : > { %2710 = vpow2.f32 %v2473_v40 }
 0x225   : > { %v2705_v9 = vpop.eup %2704 }
 0x226   : > { %v1794_v31 = vadd.f32 1.0, %v2705_v9 }
 0x227   : > { %v2707_v32 = vpop.eup %2706 }
 0x228   : > { %2712 = vrcp.f32 %v1794_v31  ;;  %v1795_v8 = vadd.f32 1.0, %v2707_v32 }
 0x229   : > { %v2709_v36 = vpop.eup %2708 }
 0x22a   : > { %2714 = vrcp.f32 %v1795_v8  ;;  %v1796_v0 = vadd.f32 1.0, %v2709_v36  ;;  %v2424_v36 = vmul.f32 -1.442695, %v3493_v58 }
 0x22b   : > { %v2711_v29 = vpop.eup %2710 }
 0x22c   : > { %2716 = vrcp.f32 %v1796_v0  ;;  %v1797_v47 = vadd.f32 1.0, %v2711_v29 }
 0x22e   : > { %2718 = vrcp.f32 %v1797_v47 }
 0x232   : > { %v2713_v48 = vpop.eup %2712 }
 0x233   : > { %1862 = vrot.lane.b32.xlu0 %v2713_v48, %s2953_s12  ;;  %v2425_v48 = vmul.f32 -1.442695, %v3495_v33 }
 0x234   : > { %v2715_v22 = vpop.eup %2714 }
 0x235   : > { %1864 = vrot.lane.b32.xlu1 %v2715_v22, %s2953_s12 }
 0x236   : > { %v2717_v53 = vpop.eup %2716  ;;  %v1679_v3 = vpop.permute.xlu0 %1678 }
 0x237   : > { %v3636_v51 = vadd.f32 %v1679_v3, %v3575_v63  ;;  %1866 = vrot.lane.b32.xlu0 %v2717_v53, %s2953_s12  ;;  %v2426_v3 = vmul.f32 -1.442695, %v3499_v34 }
 0x238   : > { %v2719_v1 = vpop.eup %2718  ;;  %v1681_v61 = vpop.permute.xlu1 %1680 }
 0x239   : > { %v2474_v2 = vmul.f32 -1.442695, %v3636_v51  ;;  %v3641_v21 = vadd.f32 %v1681_v61, %v3585_v25  ;;  %1868 = vrot.lane.b32.xlu1 %v2719_v1, %s2953_s12  ;;  %v2427_v1 = vmul.f32 -1.442695, %v3503_v10  ;;  %v2430_v61 = vmul.f32 -1.442695, %v3515_v44 }
 0x23a   : > { %v1683_v15 = vpop.permute.xlu0 %1682 }
 0x23b   : > { %2720 = vpow2.f32 %v2474_v2  ;;  %v2475_v62 = vmul.f32 -1.442695, %v3641_v21  ;;  %v3646_v16 = vadd.f32 %v1683_v15, %v3569_v17  ;;  %v2428_v2 = vmul.f32 -1.442695, %v3509_v37 }
 0x23c   : > { %v1685_v63 = vpop.permute.xlu1 %1684 }
 0x23d   : > { %2722 = vpow2.f32 %v2475_v62  ;;  %v2476_v6 = vmul.f32 -1.442695, %v3646_v16  ;;  %v3650_v42 = vadd.f32 %v1685_v63, %v3578_v27 }
 0x23f   : > { %2724 = vpow2.f32 %v2476_v6  ;;  %v2477_v25 = vmul.f32 -1.442695, %v3650_v42  ;;  %v2431_v6 = vmul.f32 -1.442695, %v3519_v20 }
 0x241   : > { %2726 = vpow2.f32 %v2477_v25 }
 0x245   : > { %v2721_v43 = vpop.eup %2720 }
 0x246   : > { %v1798_v18 = vadd.f32 1.0, %v2721_v43 }
 0x247   : > { %v2723_v19 = vpop.eup %2722 }
 0x248   : > { %2728 = vrcp.f32 %v1798_v18  ;;  %v1799_v39 = vadd.f32 1.0, %v2723_v19  ;;  %v2432_v19 = vmul.f32 -1.442695, %v3525_v30 }
 0x249   : > { %v2725_v5 = vpop.eup %2724 }
 0x24a   : > { %2730 = vrcp.f32 %v1799_v39  ;;  %v1800_v17 = vadd.f32 1.0, %v2725_v5 }
 0x24b   : > { %v2727_v12 = vpop.eup %2726 }
 0x24c   : > { %2732 = vrcp.f32 %v1800_v17  ;;  %v1801_v49 = vadd.f32 1.0, %v2727_v12 }
 0x24e   : > { %2734 = vrcp.f32 %v1801_v49 }
 0x252   : > { %v2729_v11 = vpop.eup %2728 }
 0x253   : > { %1870 = vrot.lane.b32.xlu0 %v2729_v11, %s2953_s12  ;;  %v1687_v27 = vpop.permute.xlu0 %1686  ;;  %v2434_v11 = vmul.f32 -1.442695, %v3531_v14 }
 0x254   : > { %v2731_v7 = vpop.eup %2730  ;;  %v3655_v40 = vadd.f32 %v1687_v27, %v3598_v35 }
 0x255   : > { %v1689_v9 = vpop.permute.xlu1 %1688  ;;  %1872 = vrot.lane.b32.xlu1 %v2731_v7, %s2953_s12 }
 0x256   : > { %v2733_v31 = vpop.eup %2732  ;;  %v2478_v32 = vmul.f32 -1.442695, %v3655_v40  ;;  %v3660_v8 = vadd.f32 %v1689_v9, %v3604_v46  ;;  %v2433_v9 = vmul.f32 -1.442695, %v3527_v52 }
 0x257   : > { %1874 = vrot.lane.b32.xlu0 %v2733_v31, %s2953_s12  ;;  %v1691_v0 = vpop.permute.xlu0 %1690 }
 0x258   : > { %v2735_v29 = vpop.eup %2734  ;;  %2736 = vpow2.f32 %v2478_v32  ;;  %v2479_v47 = vmul.f32 -1.442695, %v3660_v8  ;;  %v3666_v35 = vadd.f32 %v1691_v0, %v3594_v13 }
 0x259   : > { %v1693_v22 = vpop.permute.xlu1 %1692  ;;  %1876 = vrot.lane.b32.xlu1 %v2735_v29, %s2953_s12 }
 0x25a   : > { %2738 = vpow2.f32 %v2479_v47  ;;  %v2480_v46 = vmul.f32 -1.442695, %v3666_v35  ;;  %v3672_v53 = vadd.f32 %v1693_v22, %v3601_v38  ;;  %v2429_v38 = vmul.f32 -1.442695, %v3511_v41 }
 0x25b   : > { %2740 = vpow2.f32 %v2424_v36  ;;  %v2435_v47 = vmul.f32 -1.442695, %v3535_v23 }
 0x25c   : > { %2742 = vpow2.f32 %v2480_v46  ;;  %v2481_v13 = vmul.f32 -1.442695, %v3672_v53 }
 0x25d   : > { %2744 = vpow2.f32 %v2425_v48 }
 0x25e   : > { %2746 = vpow2.f32 %v2481_v13 }
 0x25f   : > { %2748 = vpow2.f32 %v2426_v3  ;;  %v2436_v3 = vmul.f32 -1.442695, %v3541_v45 }
 0x260   : > { %2750 = vpow2.f32 %v2427_v1 }
 0x261   : > { %2752 = vpow2.f32 %v2430_v61 }
 0x262   : > { %v2737_v15 = vpop.eup %2736  ;;  %2754 = vpow2.f32 %v2428_v2  ;;  %v2437_v2 = vmul.f32 -1.442695, %v3543_v54 }
 0x263   : > { %v1802_v62 = vadd.f32 1.0, %v2737_v15 }
 0x264   : > { %v2739_v63 = vpop.eup %2738 }
 0x265   : > { %v2741_v25 = vpop.eup %2740  ;;  %2756 = vrcp.f32 %v1802_v62  ;;  %v1803_v43 = vadd.f32 1.0, %v2739_v63  ;;  %v2438_v63 = vmul.f32 -1.442695, %v3547_v56 }
 0x266   : > { %v2743_v18 = vpop.eup %2742  ;;  %2758 = vpow2.f32 %v2429_v38  ;;  %v1115_v12 = vadd.f32 1.0, %v2741_v25 }
 0x267   : > { %v2745_v39 = vpop.eup %2744  ;;  %2760 = vrcp.f32 %v1803_v43  ;;  %v1804_v5 = vadd.f32 1.0, %v2743_v18  ;;  %v2439_v18 = vmul.f32 -1.442695, %v3551_v57 }
 0x268   : > { %v2747_v17 = vpop.eup %2746  ;;  %2762 = vpow2.f32 %v2431_v6  ;;  %v1116_v31 = vadd.f32 1.0, %v2745_v39 }
 0x269   : > { %v2749_v49 = vpop.eup %2748  ;;  %2764 = vrcp.f32 %v1804_v5  ;;  %v1805_v27 = vadd.f32 1.0, %v2747_v17 }
 0x26a   : > { %v2751_v7 = vpop.eup %2750  ;;  %2766 = vpow2.f32 %v2432_v19  ;;  %v1117_v36 = vadd.f32 1.0, %v2749_v49 }
 0x26b   : > { %2768 = vrcp.f32 %v1805_v27  ;;  %v2753_v32 = vpop.eup %2752  ;;  %v1118_v0 = vadd.f32 1.0, %v2751_v7 }
 0x26c   : > { %2770 = vrcp.f32 %v1115_v12  ;;  %v2755_v29 = vpop.eup %2754  ;;  %v1121_v22 = vadd.f32 1.0, %v2753_v32 }
 0x26d   : > { %2772 = vpow2.f32 %v2434_v11  ;;  %v1119_v13 = vadd.f32 1.0, %v2755_v29 }
 0x26e   : > { %2774 = vpow2.f32 %v2433_v9 }
 0x26f   : > { %v2757_v48 = vpop.eup %2756  ;;  %2776 = vrcp.f32 %v1116_v31 }
 0x270   : > { %v2759_v46 = vpop.eup %2758  ;;  %2778 = vrcp.f32 %v1117_v36  ;;  %1878 = vrot.lane.b32.xlu0 %v2757_v48, %s2953_s12 }
 0x271   : > { %v2761_v1 = vpop.eup %2760  ;;  %2780 = vrcp.f32 %v1118_v0  ;;  %v1120_v38 = vadd.f32 1.0, %v2759_v46 }
 0x272   : > { %v2763_v61 = vpop.eup %2762  ;;  %2782 = vpow2.f32 %v2435_v47  ;;  %1880 = vrot.lane.b32.xlu1 %v2761_v1, %s2953_s12 }
 0x273   : > { %v2765_v15 = vpop.eup %2764  ;;  %2784 = vrcp.f32 %v1121_v22  ;;  %v1122_v25 = vadd.f32 1.0, %v2763_v61 }
 0x274   : > { %v2767_v62 = vpop.eup %2766  ;;  %2786 = vpow2.f32 %v2436_v3  ;;  %1882 = vrot.lane.b32.xlu0 %v2765_v15, %s2953_s12 }
 0x275   : > { %v2769_v6 = vpop.eup %2768  ;;  %2788 = vrcp.f32 %v1119_v13  ;;  %v1123_v39 = vadd.f32 1.0, %v2767_v62 }
 0x276   : > { %v2771_v43 = vpop.eup %2770  ;;  %2790 = vpow2.f32 %v2437_v2  ;;  %1884 = vrot.lane.b32.xlu1 %v2769_v6, %s2953_s12 }
 0x277   : > { %v2773_v19 = vpop.eup %2772  ;;  %2792 = vrcp.f32 %v1120_v38 }
 0x278   : > { %v2775_v5 = vpop.eup %2774  ;;  %2794 = vpow2.f32 %v2438_v63  ;;  %1179 = vrot.lane.b32.xlu0 %v2771_v43, %s2953_s12  ;;  %v1125_v49 = vadd.f32 1.0, %v2773_v19 }
 0x279   : > { %v2777_v17 = vpop.eup %2776  ;;  %2796 = vrcp.f32 %v1122_v25  ;;  %v1124_v27 = vadd.f32 1.0, %v2775_v5 }
 0x27a   : > { %v2779_v12 = vpop.eup %2778  ;;  %2798 = vpow2.f32 %v2439_v18  ;;  %1181 = vrot.lane.b32.xlu1 %v2777_v17, %s2953_s12 }
 0x27b   : > { %v2781_v11 = vpop.eup %2780  ;;  %2800 = vrcp.f32 %v1123_v39 }
 0x27c   : > { %v2783_v7 = vpop.eup %2782  ;;  %2802 = vtanh.f32 %v3572_v50  ;;  %1183 = vrot.lane.b32.xlu0 %v2779_v12, %s2953_s12 }
 0x27d   : > { %v2785_v9 = vpop.eup %2784  ;;  %2804 = vtanh.f32 %v3582_v60  ;;  %v1126_v36 = vadd.f32 1.0, %v2783_v7 }
 0x27e   : > { %v2787_v31 = vpop.eup %2786  ;;  %2806 = vrcp.f32 %v1125_v49  ;;  %1185 = vrot.lane.b32.xlu1 %v2781_v11, %s2953_s12 }
 0x27f   : > { %v2789_v32 = vpop.eup %2788  ;;  %2808 = vrcp.f32 %v1124_v27  ;;  %v1127_v47 = vadd.f32 1.0, %v2787_v31 }
 0x280   : > { %v2791_v0 = vpop.eup %2790  ;;  %2810 = vtanh.f32 %v3588_v59  ;;  %1187 = vrot.lane.b32.xlu0 %v2789_v32, %s2953_s12 }
 0x281   : > { %v2793_v29 = vpop.eup %2792  ;;  %2812 = vtanh.f32 %v3591_v28  ;;  %v1128_v48 = vadd.f32 1.0, %v2791_v0 }
 0x282   : > { %v2795_v50 = vpop.eup %2794  ;;  %1189 = vrot.lane.b32.xlu1 %v2793_v29, %s2953_s12  ;;  %2814 = vrcp.f32 %v1126_v36 }
 0x283   : > { %v2797_v60 = vpop.eup %2796  ;;  %v1129_v3 = vadd.f32 1.0, %v2795_v50  ;;  %2816 = vrcp.f32 %v1127_v47 }
 0x284   : > { %v2799_v22 = vpop.eup %2798  ;;  %1191 = vrot.lane.b32.xlu0 %v2785_v9, %s2953_s12  ;;  %2818 = vrcp.f32 %v1128_v48 }
 0x285   : > { %v2801_v46 = vpop.eup %2800  ;;  %v1855_v1 = vpop.permute.xlu0 %1854  ;;  %v1130_v61 = vadd.f32 1.0, %v2799_v22  ;;  %2820 = vrcp.f32 %v1129_v3 }
 0x286   : > { %v2803_v59 = vpop.eup %2802  ;;  %1193 = vrot.lane.b32.xlu1 %v2797_v60, %s2953_s12 }
 0x287   : > { %v2805_v13 = vpop.eup %2804  ;;  %v1857_v28 = vpop.permute.xlu1 %1856  ;;  %v1902_v15 = vmul.f32 %v2803_v59, %v1855_v1  ;;  %2822 = vrcp.f32 %v1130_v61 }
 0x288   : > { %v2807_v2 = vpop.eup %2806  ;;  %v1903_v38 = vmul.f32 %v2805_v13, %v1857_v28  ;;  %1195 = vrot.lane.b32.xlu0 %v2801_v46, %s2953_s12  ;;  %2824 = vtanh.f32 %v3617_v24 }
 0x289   : > { %v2809_v62 = vpop.eup %2808  ;;  %v1859_v63 = vpop.permute.xlu0 %1858  ;;  %2826 = vtanh.f32 %v3623_v55 }
 0x28a   : > { %v2811_v6 = vpop.eup %2810  ;;  %v1918_v25 = vpack.c.bf16 %v1903_v38, %v1902_v15  ;;  %1197 = vrot.lane.b32.xlu1 %v2809_v62, %s2953_s12  ;;  %2828 = vtanh.f32 %v3627_v4 }
 0x28b   : > { %v2813_v43 = vpop.eup %2812  ;;  %v1861_v18 = vpop.permute.xlu1 %1860  ;;  %v1904_v19 = vmul.f32 %v2811_v6, %v1859_v63  ;;  %2830 = vtanh.f32 %v3630_v26 }
 0x28c   : > { %v1905_v39 = vmul.f32 %v2813_v43, %v1861_v18  ;;  %1199 = vrot.lane.b32.xlu0 %v2807_v2, %s2953_s12  ;;  %2572 = vmatprep.mubr.msk.bf16.mxu1 %vm770_vm4, %v1918_v25  ;;  %v2815_v5 = vpop.eup %2814  ;;  %2832 = vtanh.f32 %v3636_v51 }
 0x28d   : > { %v2817_v12 = vpop.eup %2816  ;;  %2834 = vtanh.f32 %v3641_v21 }
 0x28e   : > { %v1919_v17 = vpack.c.bf16 %v1905_v39, %v1904_v19  ;;  %1201 = vrot.lane.b32.xlu1 %v2815_v5, %s2953_s12  ;;  %v2819_v49 = vpop.eup %2818  ;;  %2836 = vtanh.f32 %v3646_v16 }
 0x28f   : > { %v2821_v11 = vpop.eup %2820  ;;  %2838 = vtanh.f32 %v3650_v42 }
 0x290   : > { %1203 = vrot.lane.b32.xlu0 %v2817_v12, %s2953_s12  ;;  %2573 = vmatmul.mubr.msk.bf16.vlgmr.msra.gmra.mrb[12].mxu1 %vm770_vm4, %v1919_v17  ;;  %2840 = vtanh.f32 %v3655_v40 }
 0x291   : > { %v2823_v27 = vpop.eup %2822  ;;  %2842 = vtanh.f32 %v3660_v8 }
 0x292   : > { %1205 = vrot.lane.b32.xlu1 %v2819_v49, %s2953_s12  ;;  %v2825_v9 = vpop.eup %2824  ;;  %2844 = vtanh.f32 %v3666_v35 }
 0x293   : > { %v2827_v31 = vpop.eup %2826  ;;  %2846 = vtanh.f32 %v3672_v53 }
 0x294   : > { %1207 = vrot.lane.b32.xlu0 %v2821_v11, %s2953_s12  ;;  %v2829_v47 = vpop.eup %2828  ;;  %2848 = vtanh.f32 %v3525_v30 }
 0x295   : > { %v2831_v60 = vpop.eup %2830  ;;  %2850 = vtanh.f32 %v3527_v52 }
 0x296   : > { %1209 = vrot.lane.b32.xlu1 %v2823_v27, %s2953_s12  ;;  %v2833_v4 = vpop.eup %2832  ;;  %2852 = vtanh.f32 %v3531_v14 }
 0x297   : > { %v2835_v26 = vpop.eup %2834  ;;  %2854 = vtanh.f32 %v3535_v23 }
 0x298   : > { %v2837_v61 = vpop.eup %2836  ;;  %2856 = vtanh.f32 %v3541_v45 }
 0x299   : > { %v2839_v2 = vpop.eup %2838  ;;  %2858 = vtanh.f32 %v3543_v54 }
 0x29a   : > { %v2841_v16 = vpop.eup %2840  ;;  %2860 = vtanh.f32 %v3499_v34 }
 0x29b   : > { %v2843_v42 = vpop.eup %2842  ;;  %2862 = vtanh.f32 %v3503_v10 }
 0x29c   : > { %v2845_v18 = vpop.eup %2844  ;;  %2864 = vtanh.f32 %v3493_v58 }
 0x29d   : > { %v2847_v39 = vpop.eup %2846  ;;  %2866 = vtanh.f32 %v3495_v33 }
 0x29e   : > { %2868 = vtanh.f32 %v3515_v44 }
 0x29f   : > { %2870 = vtanh.f32 %v3519_v20 }
 0x2a0   : > { %2872 = vtanh.f32 %v3509_v37 }
 0x2a1   : > { %2874 = vtanh.f32 %v3511_v41 }
 0x2a2   : > { %2876 = vtanh.f32 %v3547_v56 }
 0x2a3   : > { %2878 = vtanh.f32 %v3551_v57 }
 0x2a5   : > { %v1863_v7 = vpop.permute.xlu0 %1862 }
 0x2a6   : > { %v1906_v36 = vmul.f32 %v2825_v9, %v1863_v7 }
 0x2a7   : > { %v1865_v32 = vpop.permute.xlu1 %1864 }
 0x2a8   : > { %v1907_v0 = vmul.f32 %v2827_v31, %v1865_v32  ;;  %v2849_v31 = vpop.eup %2848 }
 0x2a9   : > { %v1867_v29 = vpop.permute.xlu0 %1866  ;;  %v2851_v52 = vpop.eup %2850 }
 0x2aa   : > { %v1920_v50 = vpack.c.bf16 %v1907_v0, %v1906_v36  ;;  %v1908_v22 = vmul.f32 %v2829_v47, %v1867_v29  ;;  %v2853_v0 = vpop.eup %2852 }
 0x2ab   : > { %v1869_v48 = vpop.permute.xlu1 %1868  ;;  %v2855_v47 = vpop.eup %2854 }
 0x2ac   : > { %v1909_v46 = vmul.f32 %v2831_v60, %v1869_v48  ;;  %2576 = vmatprep.mubr.msk.bf16.mxu1 %vm770_vm4, %v1920_v50  ;;  %v2857_v60 = vpop.eup %2856 }
 0x2ae   : > { %v1921_v24 = vpack.c.bf16 %v1909_v46, %v1908_v22  ;;  %v2859_v22 = vpop.eup %2858 }
 0x2b0   : > { %2577 = vmatmul.mubr.msk.bf16.gmra.mrb[16].mxu1 %vm770_vm4, %v1921_v24 }
 0x2c5   : > { %v1871_v55 = vpop.permute.xlu0 %1870 }
 0x2c6   : > { %v1910_v1 = vmul.f32 %v2833_v4, %v1871_v55  ;;  %v2880_v55 = vld [vmem:[%s3201_s25 + $0x10] sm:$0xf] }
 0x2c7   : > { %v1873_v3 = vpop.permute.xlu1 %1872  ;;  %v2070_v4 = vrot.slane %v2880_v55, 5  ;;  %v2888_v55 = vld [vmem:[%s3201_s25 + $0x1c] sm:$0xf] }
 0x2c8   : > { %v1911_v59 = vmul.f32 %v2835_v26, %v1873_v3  ;;  %v2881_v26 = vld [vmem:[%s3201_s25 + $0xc] sm:$0xf] }
 0x2c9   : > { %v1875_v13 = vpop.permute.xlu0 %1874  ;;  %v2492_v3 = vrot.slane %v2881_v26, 9 }
 0x2ca   : > { %v1922_v28 = vpack.c.bf16 %v1911_v59, %v1910_v1  ;;  %v1912_v38 = vmul.f32 %v2837_v61, %v1875_v13  ;;  %v2882_v59 = vld [vmem:[%s3201_s25 + $0x4] sm:$0xf]  ;;  %v2072_v61 = vrot.slane %v2070_v4, 4 }
 0x2cb   : > { %v1877_v15 = vpop.permute.xlu1 %1876  ;;  %v2063_v13 = vrot.slane %v2882_v59, 5 }
 0x2cc   : > { %v1913_v62 = vmul.f32 %v2839_v2, %v1877_v15  ;;  %2580 = vmatprep.mubr.msk.bf16.mxu1 %vm770_vm4, %v1922_v28  ;;  %v2883_v28 = vld [vmem:[%s3201_s25 + $0x14] sm:$0x1]  ;;  %v2071_v15 = vsel %vm3769_vm15, %v2492_v3, %v2070_v4  ;;  %v2077_v4 = vrot.slane %v2888_v55, 5  ;;  %v2889_v3 = vld [vmem:[%s3201_s25 + $0x2c] sm:$0x1] }
 0x2cd   : > { %v2073_v2 = vrot.slane %v2883_v28, 5  ;;  %v2087_v59 = vrot.slane %v2889_v3, 5 }
 0x2ce   : > { %v1923_v51 = vpack.c.bf16 %v1913_v62, %v1912_v38  ;;  %v2884_v38 = vld [vmem:[%s3201_s25] sm:$0xf] }
 0x2cf   : > { %v2491_v62 = vrot.slane %v2884_v38, 9  ;;  %v2891_v38 = vld [vmem:[%s3201_s25 + $0x20] sm:$0x1] }
 0x2d0   : > { %2581 = vmatmul.mubr.msk.bf16.gmra.mrb[20].mxu1 %vm770_vm4, %v1923_v51  ;;  %v3781_v51 = vld [vmem:[%s3971_s7] ss:$0 sm:$0xff] }
 0x2e2   : > { %v1879_v21 = vpop.permute.xlu0 %1878 }
 0x2e3   : > { %v1914_v6 = vmul.f32 %v2841_v16, %v1879_v21  ;;  %v2074_v21 = vsel %vm3769_vm15, %v2072_v61, %v2073_v2  ;;  %v2065_v16 = vrot.slane %v2063_v13, 4  ;;  %v2890_v61 = vld [vmem:[%s3201_s25 + $0x18] sm:$0xf] }
 0x2e4   : > { %v1881_v63 = vpop.permute.xlu1 %1880  ;;  %v2493_v28 = vrot.slane %v2890_v61, 9  ;;  %v2897_v61 = vld [vmem:[%s3201_s25 + $0x38] sm:$0x1] }
 0x2e5   : > { %v1915_v25 = vmul.f32 %v2843_v42, %v1881_v63  ;;  %v2885_v42 = vld [vmem:[%s3201_s25 + $0x8] sm:$0x1] }
 0x2e6   : > { %v1883_v43 = vpop.permute.xlu0 %1882  ;;  %v2066_v63 = vrot.slane %v2885_v42, 5  ;;  %v2078_v42 = vsel %vm3769_vm15, %v2493_v28, %v2077_v4  ;;  %v2094_v28 = vrot.slane %v2897_v61, 5 }
 0x2e7   : > { %v1924_v19 = vpack.c.bf16 %v1915_v25, %v1914_v6  ;;  %v1916_v17 = vmul.f32 %v2845_v18, %v1883_v43  ;;  %v2135_v6 = vunpack.c.l.bf16 %v2071_v15  ;;  %v2064_v43 = vsel %vm3769_vm15, %v2491_v62, %v2063_v13 }
 0x2e8   : > { %v1885_v5 = vpop.permute.xlu1 %1884  ;;  %v2079_v15 = vrot.slane %v2077_v4, 4  ;;  %v2080_v62 = vrot.slane %v2891_v38, 5 }
 0x2e9   : > { %v1917_v12 = vmul.f32 %v2847_v39, %v1885_v5  ;;  %2584 = vmatprep.mubr.msk.bf16.mxu1 %vm770_vm4, %v1924_v19  ;;  %v2136_v39 = vunpack.c.l.bf16 %v2074_v21 }
 0x2ea   : > { %v3732_v40 = vpop.permute.xlu0 %1179 }
 0x2eb   : > { %v1925_v8 = vpack.c.bf16 %v1917_v12, %v1916_v17  ;;  %v2067_v17 = vsel %vm3769_vm15, %v2065_v16, %v2066_v63 }
 0x2ec   : > { %v3734_v35 = vpop.permute.xlu1 %1181 }
 0x2ed   : > { %2585 = vmatmul.mubr.msk.bf16.gmra.mrb[24].mxu1 %vm770_vm4, %v1925_v8 }
 0x2ee   : > { %v3737_v53 = vpop.permute.xlu0 %1183 }
 0x2f0   : > { %v3740_v49 = vpop.permute.xlu1 %1185 }
 0x2f2   : > { %v3743_v11 = vpop.permute.xlu0 %1187 }
 0x2f4   : > { %v3746_v27 = vpop.permute.xlu1 %1189 }
 0x2f6   : > { %v3749_v7 = vpop.permute.xlu0 %1191 }
 0x2f8   : > { %v3752_v9 = vpop.permute.xlu1 %1193 }
 0x2fa   : > { %v1196_v30 = vpop.permute.xlu0 %1195 }
 0x2fb   : > { %v3755_v32 = vmul.f32 %v2849_v31, %v1196_v30  ;;  %v2133_v31 = vunpack.c.l.bf16 %v2064_v43 }
 0x2fc   : > { %v1198_v36 = vpop.permute.xlu1 %1197 }
 0x2fd   : > { %v3757_v14 = vmul.f32 %v2851_v52, %v1198_v36 }
 0x2fe   : > { %v1200_v23 = vpop.permute.xlu0 %1199 }
 0x2ff   : > { %v3759_v29 = vmul.f32 %v2853_v0, %v1200_v23  ;;  %v2134_v23 = vunpack.c.l.bf16 %v2067_v17 }
 0x300   : > { %v1202_v45 = vpop.permute.xlu1 %1201 }
 0x301   : > { %v3761_v50 = vmul.f32 %v2855_v47, %v1202_v45 }
 0x302   : > { %v1204_v54 = vpop.permute.xlu0 %1203 }
 0x303   : > { %v3763_v48 = vmul.f32 %v2857_v60, %v1204_v54  ;;  %v2886_v60 = vld [vmem:[%s3201_s25 + $0x28] sm:$0xf] }
 0x304   : > { %v1206_v46 = vpop.permute.xlu1 %1205  ;;  %v2084_v54 = vrot.slane %v2886_v60, 5  ;;  %v2894_v60 = vld [vmem:[%s3201_s25 + $0x34] sm:$0xf] }
 0x305   : > { %v3765_v24 = vmul.f32 %v2859_v22, %v1206_v46  ;;  %v2887_v22 = vld [vmem:[%s3201_s25 + $0x24] sm:$0xf] }
 0x306   : > { %v2494_v46 = vrot.slane %v2887_v22, 9  ;;  %v2086_v26 = vrot.slane %v2084_v54, 4 }
 0x308   : > { %v2085_v13 = vsel %vm3769_vm15, %v2494_v46, %v2084_v54  ;;  %v2088_v2 = vsel %vm3769_vm15, %v2086_v26, %v2087_v59  ;;  %v2091_v54 = vrot.slane %v2894_v60, 5  ;;  %v2895_v46 = vld [vmem:[%s3201_s25 + $0x44] sm:$0x1]  ;;  %v2896_v26 = vld [vmem:[%s3201_s25 + $0x30] sm:$0xf] }
 0x309   : > { %v2139_v21 = vunpack.c.l.bf16 %v2085_v13  ;;  %v2101_v55 = vrot.slane %v2895_v46, 5  ;;  %v2495_v3 = vrot.slane %v2896_v26, 9 }
 0x30a   : > { %v2093_v13 = vrot.slane %v2091_v54, 4 }
 0x30b   : > { %v2092_v38 = vsel %vm3769_vm15, %v2495_v3, %v2091_v54  ;;  %v2902_v54 = vld [vmem:[%s3201_s25 + $0x54] sm:$0xf] }
 0x363   : > { %v2574_v25 = vpop.f32.mrb[12].mxu1 }
 0x364   : > { %v2004_v18 = vadd.f32 %v2574_v25, %v3781_v51  ;;  %v1995_v19 = vpop.f32.mrb[13].mxu1  ;;  %v2140_v25 = vunpack.c.l.bf16 %v2088_v2 }
 0x365   : > { %v2575_v5 = vpop.f32.mrb[14].mxu1  ;;  %v1996_v8 = vadd.f32 %v3781_v51, %v1995_v19 }
 0x366   : > { %v2151_v12 = vadd.f32 %v2135_v6, %v2004_v18  ;;  %v2007_v30 = vadd.f32 %v2575_v5, %v3781_v51  ;;  %v1998_v52 = vpop.f32.mrb[15].mxu1  ;;  %v2081_v18 = vsel %vm3769_vm15, %v2079_v15, %v2080_v62  ;;  %v2137_v5 = vunpack.c.l.bf16 %v2078_v42 }
 0x367   : > { %v1999_v0 = vadd.f32 %v3781_v51, %v1998_v52  ;;  %v2149_v47 = vadd.f32 %v2133_v31, %v1996_v8 }
 0x368   : > { %v2152_v36 = vadd.f32 %v2136_v39, %v2007_v30  ;;  %2185 = vrot.lane.b32.xlu0 %v2151_v12, %s2947_s23  ;;  %v2138_v30 = vunpack.c.l.bf16 %v2081_v18 }
 0x369   : > { %v2150_v45 = vadd.f32 %v2134_v23, %v1999_v0  ;;  %v2892_v0 = vld [vmem:[%s3201_s25 + $0x40] sm:$0xf] }
 0x36a   : > { %2187 = vrot.lane.b32.xlu1 %v2152_v36, %s2947_s23  ;;  %v2098_v23 = vrot.slane %v2892_v0, 5  ;;  %v2900_v0 = vld [vmem:[%s3201_s25 + $0x58] sm:$0xf] }
 0x36c   : > { %2181 = vrot.lane.b32.xlu0 %v2149_v47, %s2947_s23  ;;  %v2893_v47 = vld [vmem:[%s3201_s25 + $0x3c] sm:$0xf]  ;;  %v2100_v22 = vrot.slane %v2098_v23, 4 }
 0x36e   : > { %2183 = vrot.lane.b32.xlu1 %v2150_v45, %s2947_s23  ;;  %v2496_v45 = vrot.slane %v2893_v47, 9  ;;  %v2102_v59 = vsel %vm3769_vm15, %v2100_v22, %v2101_v55  ;;  %v2498_v22 = vrot.slane %v2902_v54, 9 }
 0x370   : > { %v2099_v4 = vsel %vm3769_vm15, %v2496_v45, %v2098_v23  ;;  %v2112_v23 = vrot.slane %v2900_v0, 5  ;;  %v2901_v45 = vld [vmem:[%s3201_s25 + $0x50] sm:$0x1] }
 0x371   : > { %v2143_v2 = vunpack.c.l.bf16 %v2099_v4  ;;  %v2108_v60 = vrot.slane %v2901_v45, 5  ;;  %v2903_v4 = vld [vmem:[%s3201_s25 + $0x5c] sm:$0x1] }
 0x372   : > { %v2114_v55 = vrot.slane %v2112_v23, 4  ;;  %v2115_v26 = vrot.slane %v2903_v4, 5  ;;  %v2113_v61 = vsel %vm3769_vm15, %v2498_v22, %v2112_v23 }
 0x383   : > { %v2578_v16 = vpop.f32.mrb[16].mxu1 }
 0x384   : > { %v2020_v63 = vadd.f32 %v2578_v16, %v3781_v51  ;;  %v2011_v6 = vpop.f32.mrb[17].mxu1  ;;  %v2144_v16 = vunpack.c.l.bf16 %v2102_v59 }
 0x385   : > { %v2579_v43 = vpop.f32.mrb[18].mxu1  ;;  %v2012_v39 = vadd.f32 %v3781_v51, %v2011_v6 }
 0x386   : > { %v2155_v19 = vadd.f32 %v2139_v21, %v2020_v63  ;;  %v2023_v17 = vadd.f32 %v2579_v43, %v3781_v51  ;;  %v2014_v12 = vpop.f32.mrb[19].mxu1  ;;  %v2095_v63 = vsel %vm3769_vm15, %v2093_v13, %v2094_v28  ;;  %v2141_v43 = vunpack.c.l.bf16 %v2092_v38 }
 0x387   : > { %v2015_v31 = vadd.f32 %v3781_v51, %v2014_v12  ;;  %v2153_v52 = vadd.f32 %v2137_v5, %v2012_v39 }
 0x388   : > { %v2156_v8 = vadd.f32 %v2140_v25, %v2023_v17  ;;  %2193 = vrot.lane.b32.xlu0 %v2155_v19, %s2947_s23  ;;  %v2142_v17 = vunpack.c.l.bf16 %v2095_v63 }
 0x389   : > { %v2154_v36 = vadd.f32 %v2138_v30, %v2015_v31  ;;  %v2898_v31 = vld [vmem:[%s3201_s25 + $0x4c] sm:$0xf] }
 0x38a   : > { %2195 = vrot.lane.b32.xlu1 %v2156_v8, %s2947_s23  ;;  %v2105_v30 = vrot.slane %v2898_v31, 5 }
 0x38c   : > { %2189 = vrot.lane.b32.xlu0 %v2153_v52, %s2947_s23  ;;  %v2899_v52 = vld [vmem:[%s3201_s25 + $0x48] sm:$0xf]  ;;  %v2107_v47 = vrot.slane %v2105_v30, 4  ;;  %s2388_s25 = sshll.u32 %s2926_s27, 3 }
 0x38d   : > { %p371_p7 = scmp.lt.s32.totalorder %s2388_s25, 15 }
 0x38e   : > { %2191 = vrot.lane.b32.xlu1 %v2154_v36, %s2947_s23  ;;  %v2497_v36 = vrot.slane %v2899_v52, 9  ;;  %v2109_v3 = vsel %vm3769_vm15, %v2107_v47, %v2108_v60 }
 0x38f   : > { %v2146_v38 = vunpack.c.l.bf16 %v2109_v3  ;;  %s3991_s25 = smov (!%p371_p7, %s2388_s25), 15 }
 0x390   : > { %v2106_v46 = vsel %vm3769_vm15, %v2497_v36, %v2105_v30  ;;  %s2389_s27 = sshll.u32 %s3991_s25, 1 }
 0x391   : > { %v2145_v13 = vunpack.c.l.bf16 %v2106_v46  ;;  %s375_s20 = sadd.s32 %s2390_s19, %s2389_s27 }
 0x392   : > { %s2391_s21 = sshll.u32 %s375_s20, 3 }
 0x393   : > { %s3878_s24 = scalar_lea.vmem %s3972_s8, %s2391_s21 }
 0x3a3   : > { %v2582_v15 = vpop.f32.mrb[20].mxu1 }
 0x3a4   : > { %v2036_v62 = vadd.f32 %v2582_v15, %v3781_v51  ;;  %v2027_v21 = vpop.f32.mrb[21].mxu1 }
 0x3a5   : > { %v2583_v42 = vpop.f32.mrb[22].mxu1  ;;  %v2028_v25 = vadd.f32 %v3781_v51, %v2027_v21 }
 0x3a6   : > { %v2159_v6 = vadd.f32 %v2143_v2, %v2036_v62  ;;  %v2039_v18 = vadd.f32 %v2583_v42, %v3781_v51  ;;  %v2030_v19 = vpop.f32.mrb[23].mxu1  ;;  %v2116_v62 = vsel %vm3769_vm15, %v2114_v55, %v2115_v26  ;;  %v2147_v42 = vunpack.c.l.bf16 %v2113_v61 }
 0x3a7   : > { %v2031_v5 = vadd.f32 %v3781_v51, %v2030_v19  ;;  %v2157_v12 = vadd.f32 %v2141_v43, %v2028_v25  ;;  %v2148_v43 = vunpack.c.l.bf16 %v2116_v62 }
 0x3a8   : > { %v2160_v39 = vadd.f32 %v2144_v16, %v2039_v18  ;;  %2201 = vrot.lane.b32.xlu0 %v2159_v6, %s2947_s23 }
 0x3a9   : > { %v2158_v8 = vadd.f32 %v2142_v17, %v2031_v5  ;;  %v3872_v5 = vpop.permute.xlu1 %1209 }
 0x3aa   : > { %2203 = vrot.lane.b32.xlu1 %v2160_v39, %s2947_s23  ;;  %v2861_v39 = vpop.eup %2860 }
 0x3ab   : > { %v1229_v17 = vmul.f32 %v2861_v39, %v3737_v53  ;;  %v2863_v58 = vpop.eup %2862 }
 0x3ac   : > { %2197 = vrot.lane.b32.xlu0 %v2157_v12, %s2947_s23  ;;  %v1230_v33 = vmul.f32 %v2863_v58, %v3740_v49  ;;  %v2865_v12 = vpop.eup %2864 }
 0x3ad   : > { %v1227_v53 = vmul.f32 %v2865_v12, %v3732_v40  ;;  %v2867_v30 = vpop.eup %2866 }
 0x3ae   : > { %2199 = vrot.lane.b32.xlu1 %v2158_v8, %s2947_s23  ;;  %v1228_v36 = vmul.f32 %v2867_v30, %v3734_v35  ;;  %v2869_v40 = vpop.eup %2868 }
 0x3af   : > { %v1233_v35 = vmul.f32 %v2869_v40, %v3749_v7  ;;  %v2871_v47 = vpop.eup %2870 }
 0x3b0   : > { %v1234_v60 = vmul.f32 %v2871_v47, %v3752_v9  ;;  %v2873_v22 = vpop.eup %2872 }
 0x3b1   : > { %v1231_v37 = vmul.f32 %v2873_v22, %v3743_v11  ;;  %v2875_v20 = vpop.eup %2874 }
 0x3b2   : > { %v1232_v46 = vmul.f32 %v2875_v20, %v3746_v27 }
 0x3c0   : > { %v2586_v59 = vpop.f32.mrb[24].mxu1 }
 0x3c1   : > { %v2043_v28 = vpop.f32.mrb[25].mxu1  ;;  %v2052_v16 = vadd.f32 %v2586_v59, %v3781_v51 }
 0x3c2   : > { %v2044_v2 = vadd.f32 %v3781_v51, %v2043_v28  ;;  %v2587_v15 = vpop.f32.mrb[26].mxu1 }
 0x3c3   : > { %v2046_v21 = vpop.f32.mrb[27].mxu1  ;;  %v2055_v25 = vadd.f32 %v2587_v15, %v3781_v51  ;;  %v2163_v19 = vadd.f32 %v2147_v42, %v2052_v16 }
 0x3c4   : > { %v2161_v63 = vadd.f32 %v2145_v13, %v2044_v2  ;;  %v2047_v6 = vadd.f32 %v3781_v51, %v2046_v21  ;;  %v3870_v51 = vpop.permute.xlu0 %1207  ;;  %v2877_v2 = vpop.eup %2876 }
 0x3c5   : > { %v2164_v1 = vadd.f32 %v2148_v43, %v2055_v25  ;;  %v1241_v15 = vmul.f32 %v2877_v2, %v3870_v51 }
 0x3c6   : > { %v2162_v18 = vadd.f32 %v2146_v38, %v2047_v6  ;;  %2205 = vrot.lane.b32.xlu0 %v2161_v63, %s2947_s23  ;;  %v2879_v38 = vpop.eup %2878 }
 0x3c7   : > { %v1242_v57 = vmul.f32 %v2879_v38, %v3872_v5 }
 0x3c8   : > { %2207 = vrot.lane.b32.xlu1 %v2162_v18, %s2947_s23 }
 0x3ca   : > { %2209 = vrot.lane.b32.xlu0 %v2163_v19, %s2947_s23 }
 0x3cc   : > { %2211 = vrot.lane.b32.xlu1 %v2164_v1, %s2947_s23 }
 0x3da   : > { %v2186_v34 = vpop.permute.xlu0 %2185 }
 0x3db   : > { %v2231_v10 = vsel %vm770_vm4, %v1229_v17, %v2186_v34 }
 0x3dc   : > { %2247 = vst.msk [vmem:[%s3878_s24 + $0x10] sm:$0xff] %vm787_vm5, %v2231_v10  ;;  %v2188_v8 = vpop.permute.xlu1 %2187 }
 0x3dd   : > { %v2232_v31 = vsel %vm770_vm4, %v1230_v33, %v2188_v8 }
 0x3de   : > { %2248 = vst.msk [vmem:[%s3878_s24 + $0x18] sm:$0xff] %vm787_vm5, %v2232_v31  ;;  %v2182_v52 = vpop.permute.xlu0 %2181 }
 0x3df   : > { %v2229_v0 = vsel %vm770_vm4, %v1227_v53, %v2182_v52 }
 0x3e0   : > { %2245 = vst.msk [vmem:[%s3878_s24] sm:$0xff] %vm787_vm5, %v2229_v0  ;;  %v2184_v49 = vpop.permute.xlu1 %2183 }
 0x3e1   : > { %v2230_v23 = vsel %vm770_vm4, %v1228_v36, %v2184_v49 }
 0x3e2   : > { %2246 = vst.msk [vmem:[%s3878_s24 + $0x8] sm:$0xff] %vm787_vm5, %v2230_v23 }
 0x3fa   : > { %v2194_v45 = vpop.permute.xlu0 %2193 }
 0x3fb   : > { %v2235_v54 = vsel %vm770_vm4, %v1233_v35, %v2194_v45 }
 0x3fc   : > { %2251 = vst.msk [vmem:[%s3878_s24 + $0x30] sm:$0xff] %vm787_vm5, %v2235_v54  ;;  %v2196_v44 = vpop.permute.xlu1 %2195 }
 0x3fd   : > { %v2236_v41 = vsel %vm770_vm4, %v1234_v60, %v2196_v44 }
 0x3fe   : > { %2252 = vst.msk [vmem:[%s3878_s24 + $0x38] sm:$0xff] %vm787_vm5, %v2236_v41  ;;  %v2190_v7 = vpop.permute.xlu0 %2189 }
 0x3ff   : > { %v2233_v9 = vsel %vm770_vm4, %v1231_v37, %v2190_v7 }
 0x400   : > { %2249 = vst.msk [vmem:[%s3878_s24 + $0x20] sm:$0xff] %vm787_vm5, %v2233_v9  ;;  %v2192_v55 = vpop.permute.xlu1 %2191 }
 0x401   : > { %v2234_v4 = vsel %vm770_vm4, %v1232_v46, %v2192_v55 }
 0x402   : > { %2250 = vst.msk [vmem:[%s3878_s24 + $0x28] sm:$0xff] %vm787_vm5, %v2234_v4 }
 0x41a   : > { %v2202_v11 = vpop.permute.xlu0 %2201 }
 0x41b   : > { %v2239_v26 = vsel %vm770_vm4, %v3759_v29, %v2202_v11 }
 0x41c   : > { %2255 = vst.msk [vmem:[%s3878_s24 + $0x50] sm:$0xff] %vm787_vm5, %v2239_v26  ;;  %v2204_v3 = vpop.permute.xlu1 %2203 }
 0x41d   : > { %v2240_v27 = vsel %vm770_vm4, %v3761_v50, %v2204_v3 }
 0x41e   : > { %2256 = vst.msk [vmem:[%s3878_s24 + $0x58] sm:$0xff] %vm787_vm5, %v2240_v27  ;;  %v2198_v59 = vpop.permute.xlu0 %2197 }
 0x41f   : > { %v2237_v13 = vsel %vm770_vm4, %v3755_v32, %v2198_v59 }
 0x420   : > { %2253 = vst.msk [vmem:[%s3878_s24 + $0x40] sm:$0xff] %vm787_vm5, %v2237_v13  ;;  %v2200_v61 = vpop.permute.xlu1 %2199 }
 0x421   : > { %v2238_v29 = vsel %vm770_vm4, %v3757_v14, %v2200_v61 }
 0x422   : > { %2254 = vst.msk [vmem:[%s3878_s24 + $0x48] sm:$0xff] %vm787_vm5, %v2238_v29 }
 0x438   : > { %v2206_v50 = vpop.permute.xlu0 %2205 }
 0x439   : > { %v2241_v28 = vsel %vm770_vm4, %v3763_v48, %v2206_v50 }
 0x43a   : > { %2257 = vst.msk [vmem:[%s3878_s24 + $0x60] sm:$0xff] %vm787_vm5, %v2241_v28  ;;  %v2208_v32 = vpop.permute.xlu1 %2207 }
 0x43b   : > { %v2242_v14 = vsel %vm770_vm4, %v3765_v24, %v2208_v32 }
 0x43c   : > { %2258 = vst.msk [vmem:[%s3878_s24 + $0x68] sm:$0xff] %vm787_vm5, %v2242_v14  ;;  %v2210_v56 = vpop.permute.xlu0 %2209 }
 0x43d   : > { %v2243_v62 = vsel %vm770_vm4, %v1241_v15, %v2210_v56 }
 0x43e   : > { %2259 = vst.msk [vmem:[%s3878_s24 + $0x70] sm:$0xff] %vm787_vm5, %v2243_v62  ;;  %v2212_v48 = vpop.permute.xlu1 %2211 }
 0x43f   : > { %v2244_v21 = vsel %vm770_vm4, %v1242_v57, %v2212_v48 }
 0x440   : > { %2260 = vst.msk [vmem:[%s3878_s24 + $0x78] sm:$0xff] %vm787_vm5, %v2244_v21 }
 0x441 PF: > { %s18_s9 = sadd.s32 1, %s2942_s9   ;;  %s3978_s27 = smov %s2934_s29 }
 0x442   : > { %p15_p8 = scmp.ge.s32.totalorder %s18_s9, 6   ;;  %s3979_s28 = smov %s2938_s30 }
 0x443   : > { %s3980_s29 = smov %s3983_s10  ;;  %s3981_s30 = smov %s3987_s11 }
 0x444   :  { %17 = sbr.rel (!%p15_p8) target bundleno = 3 (0x3), region = 85 }

</bundles_post_ra>
